<compile_context>
chip_gen: v7x
topology: tpu7x:2x2x1
jax: 0.10.0
libtpu: 0.0.40
codegen_flags: <defaults>
</compile_context>

<pallas_src>
import jax
import jax.numpy as jnp
from jax.experimental import pallas as pl
from jax.experimental.pallas import tpu as pltpu


def _make_gru_chunk_kernel(total_T, chunk_T):
    """Kernel factory: closes over static sequence length / chunk size."""
    needs_mask = (total_T % chunk_T) != 0

    def kernel(x_ref,
               wih_r_ref, wih_z_ref, wih_n_ref,
               whh_r_ref, whh_z_ref, whh_n_ref,
               b_r_ref, b_z_ref, b_in_ref, b_hn_ref,
               out_ref):
        c = pl.program_id(1)  # time-chunk index (serial / "arbitrary")

        @pl.when(c == 0)
        def _():
            # init_hidden(): zeros. out_ref is resident across time chunks and
            # carries the hidden state (no separate VMEM scratch needed).
            out_ref[...] = jnp.zeros_like(out_ref)

        Bc, Tc, D = x_ref.shape
        H = out_ref.shape[-1]

        # ---- Hoisted input projection: one big matmul per gate for the whole
        # chunk, with the (b_ih [+ b_hh]) bias folded in. f32 accumulation.
        x2d = x_ref[...].reshape(Bc * Tc, D)
        gi_r = (jnp.dot(x2d, wih_r_ref[...], preferred_element_type=jnp.float32)
                + b_r_ref[...]).reshape(Bc, Tc, H)
        gi_z = (jnp.dot(x2d, wih_z_ref[...], preferred_element_type=jnp.float32)
                + b_z_ref[...]).reshape(Bc, Tc, H)
        gi_n = (jnp.dot(x2d, wih_n_ref[...], preferred_element_type=jnp.float32)
                + b_in_ref[...]).reshape(Bc, Tc, H)

        whh_r = whh_r_ref[...]
        whh_z = whh_z_ref[...]
        whh_n = whh_n_ref[...]
        # b_hh_n must stay inside the r * (.) term; broadcast once per chunk.
        b_hn = jnp.broadcast_to(b_hn_ref[...], (Bc, H)).astype(jnp.float32)

        h = out_ref[...]  # (Bc, H) f32 hidden state carried across chunks

        # ---- Recurrence over the chunk. Static Python unroll: every per-step
        # gate slice is a static, lane-aligned access (per-gate weights), and
        # only the small hidden matmuls + VPU/EUP gate math sit on the serial
        # critical path. Gate elementwise math is kept in f32 (v5e-safe).
        for tc in range(Tc):
            hw = h.astype(whh_r.dtype)
            gh_r = jnp.dot(hw, whh_r, preferred_element_type=jnp.float32)
            gh_z = jnp.dot(hw, whh_z, preferred_element_type=jnp.float32)
            gh_n = jnp.dot(hw, whh_n, preferred_element_type=jnp.float32) + b_hn

            r = jax.nn.sigmoid(gi_r[:, tc, :] + gh_r)
            z = jax.nn.sigmoid(gi_z[:, tc, :] + gh_z)
            n = jnp.tanh(gi_n[:, tc, :] + r * gh_n)
            h_new = (1.0 - z) * n + z * h

            if needs_mask:
                # Ragged last chunk: steps with global t >= T leave h unchanged.
                valid = (c * chunk_T + tc) < total_T
                h = jnp.where(valid, h_new, h)
            else:
                h = h_new

        out_ref[...] = h

    return kernel


def question_embedding_forward(x, w_ih, w_hh, b_ih, b_hh, num_hid,
                               *, time_chunk=64, batch_block=None,
                               compute_dtype=jnp.float32):
    """x: (B, T, in_dim) batch_first (PyTorch convention).
    w_ih: (3H, in_dim), w_hh: (3H, H), b_ih/b_hh: (3H,) in PyTorch GRU gate
    order (r, z, n). Returns (B, H) == output[:, -1] (f32).

    compute_dtype: dtype of the MXU matmul operands (bf16 recommended on
    v6e/v7x); accumulation, hidden state and gate math stay in f32."""
    B, T, in_dim = x.shape
    H = num_hid
    assert w_ih.shape == (3 * H, in_dim)
    assert w_hh.shape == (3 * H, H)

    Bc = B if batch_block is None else batch_block
    assert B % Bc == 0, "batch_block must divide batch"
    Tc = T if T <= time_chunk else time_chunk
    nb = B // Bc
    nc = pl.cdiv(T, Tc)

    # Per-gate transposed weights -> lane-aligned gate blocks, plain row-major
    # MXU dots (no sub-vreg slicing of a fused (.., 3H) gate tensor).
    wih_r = w_ih[0 * H:1 * H].T.astype(compute_dtype)
    wih_z = w_ih[1 * H:2 * H].T.astype(compute_dtype)
    wih_n = w_ih[2 * H:3 * H].T.astype(compute_dtype)
    whh_r = w_hh[0 * H:1 * H].T.astype(compute_dtype)
    whh_z = w_hh[1 * H:2 * H].T.astype(compute_dtype)
    whh_n = w_hh[2 * H:3 * H].T.astype(compute_dtype)

    # Bias folding: r/z gates use (b_ih + b_hh); n gate keeps b_hh_n inside
    # the r * (.) term, so only b_ih_n folds into the input projection.
    b_r = (b_ih[0 * H:1 * H] + b_hh[0 * H:1 * H]).reshape(1, H).astype(jnp.float32)
    b_z = (b_ih[1 * H:2 * H] + b_hh[1 * H:2 * H]).reshape(1, H).astype(jnp.float32)
    b_in = b_ih[2 * H:3 * H].reshape(1, H).astype(jnp.float32)
    b_hn = b_hh[2 * H:3 * H].reshape(1, H).astype(jnp.float32)

    x_in = x.astype(compute_dtype)  # batch_first; no wrapper transpose of x

    kernel = _make_gru_chunk_kernel(total_T=T, chunk_T=Tc)

    const = lambda b, c: (0, 0)  # resident weights / biases
    grid_spec = pltpu.PrefetchScalarGridSpec(
        num_scalar_prefetch=0,
        grid=(nb, nc),
        in_specs=[
            pl.BlockSpec((Bc, Tc, in_dim), lambda b, c: (b, c, 0)),  # x chunk
            pl.BlockSpec((in_dim, H), const),                        # W_ih_r^T
            pl.BlockSpec((in_dim, H), const),                        # W_ih_z^T
            pl.BlockSpec((in_dim, H), const),                        # W_ih_n^T
            pl.BlockSpec((H, H), const),                             # W_hh_r^T
            pl.BlockSpec((H, H), const),                             # W_hh_z^T
            pl.BlockSpec((H, H), const),                             # W_hh_n^T
            pl.BlockSpec((1, H), const),                             # b_r folded
            pl.BlockSpec((1, H), const),                             # b_z folded
            pl.BlockSpec((1, H), const),                             # b_ih_n
            pl.BlockSpec((1, H), const),                             # b_hh_n
        ],
        # Constant index over the (last, serial) time axis -> resident
        # accumulator block that carries the hidden state.
        out_specs=pl.BlockSpec((Bc, H), lambda b, c: (b, 0)),
    )

    # TODO(synk): for realistic MEVF sizes (in_dim~600, H=1024) on v7x, set
    # pltpu.CompilerParams(vmem_limit_bytes=...) explicitly and consider
    # pipeline_mode=pl.Buffered(1) on the invariant weight specs to avoid
    # double-buffering ~20 MB of weights.
    return pl.pallas_call(
        kernel,
        out_shape=jax.ShapeDtypeStruct((B, H), jnp.float32),
        grid_spec=grid_spec,
        compiler_params=pltpu.CompilerParams(
            # batch blocks are independent (megacore-splittable on v7x);
            # time chunks are a serial recurrence.
            dimension_semantics=("parallel", "arbitrary"),
        ),
    )(x_in, wih_r, wih_z, wih_n, whh_r, whh_z, whh_n, b_r, b_z, b_in, b_hn)


def reference_gru_last(x, w_ih, w_hh, b_ih, b_hh, num_hid):
    """Pure-JAX reference of PyTorch nn.GRU(batch_first=True) + output[:, -1]."""
    B, T, _ = x.shape
    H = num_hid

    def step(h, x_t):
        gi = x_t @ w_ih.T + b_ih
        gh = h @ w_hh.T + b_hh
        i_r, i_z, i_n = gi[:, :H], gi[:, H:2 * H], gi[:, 2 * H:]
        h_r, h_z, h_n = gh[:, :H], gh[:, H:2 * H], gh[:, 2 * H:]
        r = jax.nn.sigmoid(i_r + h_r)
        z = jax.nn.sigmoid(i_z + h_z)
        n = jnp.tanh(i_n + r * h_n)
        h_new = (1.0 - z) * n + z * h
        return h_new, None

    h0 = jnp.zeros((B, H), jnp.float32)
    h_last, _ = jax.lax.scan(step, h0, jnp.transpose(x, (1, 0, 2)))
    return h_last


if __name__ == "__main__":
    # Module config (GRU, single layer, unidirectional), small demo shapes.
    in_dim = 16
    num_hid = 32
    batch = 2
    seq = 8

    key = jax.random.PRNGKey(0)
    kx, k1, k2, k3, k4, kx2 = jax.random.split(key, 6)

    # Deterministic "PyTorch-style" init: U(-1/sqrt(H), 1/sqrt(H))
    bound = 1.0 / (num_hid ** 0.5)
    x = jax.random.normal(kx, (batch, seq, in_dim), dtype=jnp.float32)
    w_ih = jax.random.uniform(k1, (3 * num_hid, in_dim), jnp.float32, -bound, bound)
    w_hh = jax.random.uniform(k2, (3 * num_hid, num_hid), jnp.float32, -bound, bound)
    b_ih = jax.random.uniform(k3, (3 * num_hid,), jnp.float32, -bound, bound)
    b_hh = jax.random.uniform(k4, (3 * num_hid,), jnp.float32, -bound, bound)

    # f32 path (exact match vs pure-JAX reference)
    out = question_embedding_forward(x, w_ih, w_hh, b_ih, b_hh, num_hid)
    out = jax.block_until_ready(out)
    ref = reference_gru_last(x, w_ih, w_hh, b_ih, b_hh, num_hid)
    assert out.shape == (batch, num_hid)
    assert jnp.allclose(out, ref, rtol=1e-4, atol=1e-4), "f32 mismatch vs reference"

    # bf16 matmul-operand path (v6e/v7x MXU optimization; f32 accum + gates)
    out_bf16 = question_embedding_forward(
        x, w_ih, w_hh, b_ih, b_hh, num_hid, compute_dtype=jnp.bfloat16)
    out_bf16 = jax.block_until_ready(out_bf16)
    assert jnp.allclose(out_bf16, ref, rtol=0.0, atol=0.1), "bf16 mismatch vs reference"

    # Multi-chunk + ragged-tail path (T not a multiple of the time chunk).
    x2 = jax.random.normal(kx2, (batch, 20, in_dim), dtype=jnp.float32)
    out2 = question_embedding_forward(x2, w_ih, w_hh, b_ih, b_hh, num_hid, time_chunk=8)
    out2 = jax.block_until_ready(out2)
    ref2 = reference_gru_last(x2, w_ih, w_hh, b_ih, b_hh, num_hid)
    assert jnp.allclose(out2, ref2, rtol=1e-4, atol=1e-4), "chunked mismatch vs reference"

    # TODO(synk): bidirectional / multi-layer / LSTM / dropout variants of the
    # module are not exercised by this config; only the GRU nlayers=1,
    # bidirect=False path (forward -> output[:, -1]) is implemented.
    print("KERNEL_OK")
</pallas_src>

<mosaic_0001>
module attributes {stable_mosaic.version = 11 : i64} {
  func.func @kernel(%arg0: i32, %arg1: i32, %arg2: memref<2x8x16xf32, #tpu.memory_space<vmem>>, %arg3: memref<16x32xf32, #tpu.memory_space<vmem>>, %arg4: memref<16x32xf32, #tpu.memory_space<vmem>>, %arg5: memref<16x32xf32, #tpu.memory_space<vmem>>, %arg6: memref<32x32xf32, #tpu.memory_space<vmem>>, %arg7: memref<32x32xf32, #tpu.memory_space<vmem>>, %arg8: memref<32x32xf32, #tpu.memory_space<vmem>>, %arg9: memref<1x32xf32, #tpu.memory_space<vmem>>, %arg10: memref<1x32xf32, #tpu.memory_space<vmem>>, %arg11: memref<1x32xf32, #tpu.memory_space<vmem>>, %arg12: memref<1x32xf32, #tpu.memory_space<vmem>>, %arg13: memref<2x32xf32, #tpu.memory_space<vmem>>) attributes {dimension_semantics = [#tpu.dimension_semantics<parallel>, #tpu.dimension_semantics<arbitrary>], iteration_bounds = array<i64: 1, 1>, scalar_prefetch = 0 : i64, scratch_operands = 0 : i64, tpu.core_type = #tpu.core_type<tc>, window_params = [{transform_indices = @transform_0, window_bounds = array<i64: 2, 8, 16>}, {pipeline_mode = #tpu.pipeline_mode<synchronous>, transform_indices = @transform_1, window_bounds = array<i64: 16, 32>}, {pipeline_mode = #tpu.pipeline_mode<synchronous>, transform_indices = @transform_2, window_bounds = array<i64: 16, 32>}, {pipeline_mode = #tpu.pipeline_mode<synchronous>, transform_indices = @transform_3, window_bounds = array<i64: 16, 32>}, {pipeline_mode = #tpu.pipeline_mode<synchronous>, transform_indices = @transform_4, window_bounds = array<i64: 32, 32>}, {pipeline_mode = #tpu.pipeline_mode<synchronous>, transform_indices = @transform_5, window_bounds = array<i64: 32, 32>}, {pipeline_mode = #tpu.pipeline_mode<synchronous>, transform_indices = @transform_6, window_bounds = array<i64: 32, 32>}, {pipeline_mode = #tpu.pipeline_mode<synchronous>, transform_indices = @transform_7, window_bounds = array<i64: 1, 32>}, {pipeline_mode = #tpu.pipeline_mode<synchronous>, transform_indices = @transform_8, window_bounds = array<i64: 1, 32>}, {pipeline_mode = #tpu.pipeline_mode<synchronous>, transform_indices = @transform_9, window_bounds = array<i64: 1, 32>}, {pipeline_mode = #tpu.pipeline_mode<synchronous>, transform_indices = @transform_10, window_bounds = array<i64: 1, 32>}, {transform_indices = @transform_11, window_bounds = array<i64: 2, 32>}]} {
    %c0_i32 = arith.constant 0 : i32
    %0 = arith.cmpi eq, %arg1, %c0_i32 : i32
    %1 = arith.extui %0 : i1 to i32
    %c0_i32_0 = arith.constant 0 : i32
    %2 = arith.cmpi ne, %1, %c0_i32_0 : i32
    scf.if %2 {
      %cst_77 = arith.constant 0.000000e+00 : f32
      %271 = vector.broadcast %cst_77 : f32 to vector<2x32xf32>
      %c0_78 = arith.constant 0 : index
      %c0_79 = arith.constant 0 : index
      %272 = vector.load %arg13[%c0_78, %c0_79] : memref<2x32xf32, #tpu.memory_space<vmem>>, vector<2x32xf32>
      tpu.vector_store %arg13[%c0_78, %c0_79], %271 {strides = array<i32>} : memref<2x32xf32, #tpu.memory_space<vmem>>, vector<2x32xf32>,
    } else {
    }
    %c0 = arith.constant 0 : index
    %c0_1 = arith.constant 0 : index
    %c0_2 = arith.constant 0 : index
    %3 = vector.load %arg2[%c0, %c0_1, %c0_2] : memref<2x8x16xf32, #tpu.memory_space<vmem>>, vector<2x8x16xf32>
    %4 = vector.shape_cast %3 : vector<2x8x16xf32> to vector<16x16xf32>
    %c0_3 = arith.constant 0 : index
    %c0_4 = arith.constant 0 : index
    %5 = vector.load %arg3[%c0_3, %c0_4] : memref<16x32xf32, #tpu.memory_space<vmem>>, vector<16x32xf32>
    %cst = arith.constant dense<0.000000e+00> : vector<16x32xf32>
    %6 = tpu.matmul %4, %5, %cst {dimension_numbers = #tpu.dot_dimension_numbers<[1], [0], [0], [1], [0, 0, 1, 1], [], []>} : vector<16x16xf32>, vector<16x32xf32>, vector<16x32xf32> -> vector<16x32xf32>
    %c0_5 = arith.constant 0 : index
    %c0_6 = arith.constant 0 : index
    %7 = vector.load %arg9[%c0_5, %c0_6] : memref<1x32xf32, #tpu.memory_space<vmem>>, vector<1x32xf32>
    %8 = vector.broadcast %7 : vector<1x32xf32> to vector<16x32xf32>
    %9 = arith.addf %6, %8 : vector<16x32xf32>
    %10 = vector.shape_cast %9 : vector<16x32xf32> to vector<2x8x32xf32>
    %c0_7 = arith.constant 0 : index
    %c0_8 = arith.constant 0 : index
    %11 = vector.load %arg4[%c0_7, %c0_8] : memref<16x32xf32, #tpu.memory_space<vmem>>, vector<16x32xf32>
    %cst_9 = arith.constant dense<0.000000e+00> : vector<16x32xf32>
    %12 = tpu.matmul %4, %11, %cst_9 {dimension_numbers = #tpu.dot_dimension_numbers<[1], [0], [0], [1], [0, 0, 1, 1], [], []>} : vector<16x16xf32>, vector<16x32xf32>, vector<16x32xf32> -> vector<16x32xf32>
    %c0_10 = arith.constant 0 : index
    %c0_11 = arith.constant 0 : index
    %13 = vector.load %arg10[%c0_10, %c0_11] : memref<1x32xf32, #tpu.memory_space<vmem>>, vector<1x32xf32>
    %14 = vector.broadcast %13 : vector<1x32xf32> to vector<16x32xf32>
    %15 = arith.addf %12, %14 : vector<16x32xf32>
    %16 = vector.shape_cast %15 : vector<16x32xf32> to vector<2x8x32xf32>
    %c0_12 = arith.constant 0 : index
    %c0_13 = arith.constant 0 : index
    %17 = vector.load %arg5[%c0_12, %c0_13] : memref<16x32xf32, #tpu.memory_space<vmem>>, vector<16x32xf32>
    %cst_14 = arith.constant dense<0.000000e+00> : vector<16x32xf32>
    %18 = tpu.matmul %4, %17, %cst_14 {dimension_numbers = #tpu.dot_dimension_numbers<[1], [0], [0], [1], [0, 0, 1, 1], [], []>} : vector<16x16xf32>, vector<16x32xf32>, vector<16x32xf32> -> vector<16x32xf32>
    %c0_15 = arith.constant 0 : index
    %c0_16 = arith.constant 0 : index
    %19 = vector.load %arg11[%c0_15, %c0_16] : memref<1x32xf32, #tpu.memory_space<vmem>>, vector<1x32xf32>
    %20 = vector.broadcast %19 : vector<1x32xf32> to vector<16x32xf32>
    %21 = arith.addf %18, %20 : vector<16x32xf32>
    %22 = vector.shape_cast %21 : vector<16x32xf32> to vector<2x8x32xf32>
    %c0_17 = arith.constant 0 : index
    %c0_18 = arith.constant 0 : index
    %23 = vector.load %arg6[%c0_17, %c0_18] : memref<32x32xf32, #tpu.memory_space<vmem>>, vector<32x32xf32>
    %c0_19 = arith.constant 0 : index
    %c0_20 = arith.constant 0 : index
    %24 = vector.load %arg7[%c0_19, %c0_20] : memref<32x32xf32, #tpu.memory_space<vmem>>, vector<32x32xf32>
    %c0_21 = arith.constant 0 : index
    %c0_22 = arith.constant 0 : index
    %25 = vector.load %arg8[%c0_21, %c0_22] : memref<32x32xf32, #tpu.memory_space<vmem>>, vector<32x32xf32>
    %c0_23 = arith.constant 0 : index
    %c0_24 = arith.constant 0 : index
    %26 = vector.load %arg12[%c0_23, %c0_24] : memref<1x32xf32, #tpu.memory_space<vmem>>, vector<1x32xf32>
    %27 = vector.shape_cast %26 : vector<1x32xf32> to vector<1x32xf32>
    %28 = vector.broadcast %27 : vector<1x32xf32> to vector<2x32xf32>
    %c0_25 = arith.constant 0 : index
    %c0_26 = arith.constant 0 : index
    %29 = vector.load %arg13[%c0_25, %c0_26] : memref<2x32xf32, #tpu.memory_space<vmem>>, vector<2x32xf32>
    %cst_27 = arith.constant dense<0.000000e+00> : vector<2x32xf32>
    %30 = tpu.matmul %29, %23, %cst_27 {dimension_numbers = #tpu.dot_dimension_numbers<[1], [0], [0], [1], [0, 0, 1, 1], [], []>} : vector<2x32xf32>, vector<32x32xf32>, vector<2x32xf32> -> vector<2x32xf32>
    %cst_28 = arith.constant dense<0.000000e+00> : vector<2x32xf32>
    %31 = tpu.matmul %29, %24, %cst_28 {dimension_numbers = #tpu.dot_dimension_numbers<[1], [0], [0], [1], [0, 0, 1, 1], [], []>} : vector<2x32xf32>, vector<32x32xf32>, vector<2x32xf32> -> vector<2x32xf32>
    %cst_29 = arith.constant dense<0.000000e+00> : vector<2x32xf32>
    %32 = tpu.matmul %29, %25, %cst_29 {dimension_numbers = #tpu.dot_dimension_numbers<[1], [0], [0], [1], [0, 0, 1, 1], [], []>} : vector<2x32xf32>, vector<32x32xf32>, vector<2x32xf32> -> vector<2x32xf32>
    %33 = arith.addf %32, %28 : vector<2x32xf32>
    %34 = vector.extract_strided_slice %10 {offsets = [0, 0, 0], sizes = [2, 1, 32], strides = [1, 1, 1]} : vector<2x8x32xf32> to vector<2x1x32xf32>
    %35 = vector.shape_cast %34 : vector<2x1x32xf32> to vector<2x32xf32>
    %36 = arith.addf %35, %30 : vector<2x32xf32>
    %37 = arith.negf %36 : vector<2x32xf32>
    %38 = math.exp %37 : vector<2x32xf32>
    %cst_30 = arith.constant 1.000000e+00 : f32
    %39 = vector.broadcast %cst_30 : f32 to vector<2x32xf32>
    %40 = arith.addf %39, %38 : vector<2x32xf32>
    %41 = arith.divf %39, %40 : vector<2x32xf32>
    %42 = vector.extract_strided_slice %16 {offsets = [0, 0, 0], sizes = [2, 1, 32], strides = [1, 1, 1]} : vector<2x8x32xf32> to vector<2x1x32xf32>
    %43 = vector.shape_cast %42 : vector<2x1x32xf32> to vector<2x32xf32>
    %44 = arith.addf %43, %31 : vector<2x32xf32>
    %45 = arith.negf %44 : vector<2x32xf32>
    %46 = math.exp %45 : vector<2x32xf32>
    %cst_31 = arith.constant 1.000000e+00 : f32
    %47 = vector.broadcast %cst_31 : f32 to vector<2x32xf32>
    %48 = arith.addf %47, %46 : vector<2x32xf32>
    %49 = arith.divf %47, %48 : vector<2x32xf32>
    %50 = vector.extract_strided_slice %22 {offsets = [0, 0, 0], sizes = [2, 1, 32], strides = [1, 1, 1]} : vector<2x8x32xf32> to vector<2x1x32xf32>
    %51 = vector.shape_cast %50 : vector<2x1x32xf32> to vector<2x32xf32>
    %52 = arith.mulf %41, %33 : vector<2x32xf32>
    %53 = arith.addf %51, %52 : vector<2x32xf32>
    %54 = math.tanh %53 : vector<2x32xf32>
    %cst_32 = arith.constant 1.000000e+00 : f32
    %55 = vector.broadcast %cst_32 : f32 to vector<2x32xf32>
    %56 = arith.subf %55, %49 : vector<2x32xf32>
    %57 = arith.mulf %56, %54 : vector<2x32xf32>
    %58 = arith.mulf %49, %29 : vector<2x32xf32>
    %59 = arith.addf %57, %58 : vector<2x32xf32>
    %cst_33 = arith.constant dense<0.000000e+00> : vector<2x32xf32>
    %60 = tpu.matmul %59, %23, %cst_33 {dimension_numbers = #tpu.dot_dimension_numbers<[1], [0], [0], [1], [0, 0, 1, 1], [], []>} : vector<2x32xf32>, vector<32x32xf32>, vector<2x32xf32> -> vector<2x32xf32>
    %cst_34 = arith.constant dense<0.000000e+00> : vector<2x32xf32>
    %61 = tpu.matmul %59, %24, %cst_34 {dimension_numbers = #tpu.dot_dimension_numbers<[1], [0], [0], [1], [0, 0, 1, 1], [], []>} : vector<2x32xf32>, vector<32x32xf32>, vector<2x32xf32> -> vector<2x32xf32>
    %cst_35 = arith.constant dense<0.000000e+00> : vector<2x32xf32>
    %62 = tpu.matmul %59, %25, %cst_35 {dimension_numbers = #tpu.dot_dimension_numbers<[1], [0], [0], [1], [0, 0, 1, 1], [], []>} : vector<2x32xf32>, vector<32x32xf32>, vector<2x32xf32> -> vector<2x32xf32>
    %63 = arith.addf %62, %28 : vector<2x32xf32>
    %64 = vector.extract_strided_slice %10 {offsets = [0, 1, 0], sizes = [2, 1, 32], strides = [1, 1, 1]} : vector<2x8x32xf32> to vector<2x1x32xf32>
    %65 = vector.shape_cast %64 : vector<2x1x32xf32> to vector<2x32xf32>
    %66 = arith.addf %65, %60 : vector<2x32xf32>
    %67 = arith.negf %66 : vector<2x32xf32>
    %68 = math.exp %67 : vector<2x32xf32>
    %cst_36 = arith.constant 1.000000e+00 : f32
    %69 = vector.broadcast %cst_36 : f32 to vector<2x32xf32>
    %70 = arith.addf %69, %68 : vector<2x32xf32>
    %71 = arith.divf %69, %70 : vector<2x32xf32>
    %72 = vector.extract_strided_slice %16 {offsets = [0, 1, 0], sizes = [2, 1, 32], strides = [1, 1, 1]} : vector<2x8x32xf32> to vector<2x1x32xf32>
    %73 = vector.shape_cast %72 : vector<2x1x32xf32> to vector<2x32xf32>
    %74 = arith.addf %73, %61 : vector<2x32xf32>
    %75 = arith.negf %74 : vector<2x32xf32>
    %76 = math.exp %75 : vector<2x32xf32>
    %cst_37 = arith.constant 1.000000e+00 : f32
    %77 = vector.broadcast %cst_37 : f32 to vector<2x32xf32>
    %78 = arith.addf %77, %76 : vector<2x32xf32>
    %79 = arith.divf %77, %78 : vector<2x32xf32>
    %80 = vector.extract_strided_slice %22 {offsets = [0, 1, 0], sizes = [2, 1, 32], strides = [1, 1, 1]} : vector<2x8x32xf32> to vector<2x1x32xf32>
    %81 = vector.shape_cast %80 : vector<2x1x32xf32> to vector<2x32xf32>
    %82 = arith.mulf %71, %63 : vector<2x32xf32>
    %83 = arith.addf %81, %82 : vector<2x32xf32>
    %84 = math.tanh %83 : vector<2x32xf32>
    %cst_38 = arith.constant 1.000000e+00 : f32
    %85 = vector.broadcast %cst_38 : f32 to vector<2x32xf32>
    %86 = arith.subf %85, %79 : vector<2x32xf32>
    %87 = arith.mulf %86, %84 : vector<2x32xf32>
    %88 = arith.mulf %79, %59 : vector<2x32xf32>
    %89 = arith.addf %87, %88 : vector<2x32xf32>
    %cst_39 = arith.constant dense<0.000000e+00> : vector<2x32xf32>
    %90 = tpu.matmul %89, %23, %cst_39 {dimension_numbers = #tpu.dot_dimension_numbers<[1], [0], [0], [1], [0, 0, 1, 1], [], []>} : vector<2x32xf32>, vector<32x32xf32>, vector<2x32xf32> -> vector<2x32xf32>
    %cst_40 = arith.constant dense<0.000000e+00> : vector<2x32xf32>
    %91 = tpu.matmul %89, %24, %cst_40 {dimension_numbers = #tpu.dot_dimension_numbers<[1], [0], [0], [1], [0, 0, 1, 1], [], []>} : vector<2x32xf32>, vector<32x32xf32>, vector<2x32xf32> -> vector<2x32xf32>
    %cst_41 = arith.constant dense<0.000000e+00> : vector<2x32xf32>
    %92 = tpu.matmul %89, %25, %cst_41 {dimension_numbers = #tpu.dot_dimension_numbers<[1], [0], [0], [1], [0, 0, 1, 1], [], []>} : vector<2x32xf32>, vector<32x32xf32>, vector<2x32xf32> -> vector<2x32xf32>
    %93 = arith.addf %92, %28 : vector<2x32xf32>
    %94 = vector.extract_strided_slice %10 {offsets = [0, 2, 0], sizes = [2, 1, 32], strides = [1, 1, 1]} : vector<2x8x32xf32> to vector<2x1x32xf32>
    %95 = vector.shape_cast %94 : vector<2x1x32xf32> to vector<2x32xf32>
    %96 = arith.addf %95, %90 : vector<2x32xf32>
    %97 = arith.negf %96 : vector<2x32xf32>
    %98 = math.exp %97 : vector<2x32xf32>
    %cst_42 = arith.constant 1.000000e+00 : f32
    %99 = vector.broadcast %cst_42 : f32 to vector<2x32xf32>
    %100 = arith.addf %99, %98 : vector<2x32xf32>
    %101 = arith.divf %99, %100 : vector<2x32xf32>
    %102 = vector.extract_strided_slice %16 {offsets = [0, 2, 0], sizes = [2, 1, 32], strides = [1, 1, 1]} : vector<2x8x32xf32> to vector<2x1x32xf32>
    %103 = vector.shape_cast %102 : vector<2x1x32xf32> to vector<2x32xf32>
    %104 = arith.addf %103, %91 : vector<2x32xf32>
    %105 = arith.negf %104 : vector<2x32xf32>
    %106 = math.exp %105 : vector<2x32xf32>
    %cst_43 = arith.constant 1.000000e+00 : f32
    %107 = vector.broadcast %cst_43 : f32 to vector<2x32xf32>
    %108 = arith.addf %107, %106 : vector<2x32xf32>
    %109 = arith.divf %107, %108 : vector<2x32xf32>
    %110 = vector.extract_strided_slice %22 {offsets = [0, 2, 0], sizes = [2, 1, 32], strides = [1, 1, 1]} : vector<2x8x32xf32> to vector<2x1x32xf32>
    %111 = vector.shape_cast %110 : vector<2x1x32xf32> to vector<2x32xf32>
    %112 = arith.mulf %101, %93 : vector<2x32xf32>
    %113 = arith.addf %111, %112 : vector<2x32xf32>
    %114 = math.tanh %113 : vector<2x32xf32>
    %cst_44 = arith.constant 1.000000e+00 : f32
    %115 = vector.broadcast %cst_44 : f32 to vector<2x32xf32>
    %116 = arith.subf %115, %109 : vector<2x32xf32>
    %117 = arith.mulf %116, %114 : vector<2x32xf32>
    %118 = arith.mulf %109, %89 : vector<2x32xf32>
    %119 = arith.addf %117, %118 : vector<2x32xf32>
    %cst_45 = arith.constant dense<0.000000e+00> : vector<2x32xf32>
    %120 = tpu.matmul %119, %23, %cst_45 {dimension_numbers = #tpu.dot_dimension_numbers<[1], [0], [0], [1], [0, 0, 1, 1], [], []>} : vector<2x32xf32>, vector<32x32xf32>, vector<2x32xf32> -> vector<2x32xf32>
    %cst_46 = arith.constant dense<0.000000e+00> : vector<2x32xf32>
    %121 = tpu.matmul %119, %24, %cst_46 {dimension_numbers = #tpu.dot_dimension_numbers<[1], [0], [0], [1], [0, 0, 1, 1], [], []>} : vector<2x32xf32>, vector<32x32xf32>, vector<2x32xf32> -> vector<2x32xf32>
    %cst_47 = arith.constant dense<0.000000e+00> : vector<2x32xf32>
    %122 = tpu.matmul %119, %25, %cst_47 {dimension_numbers = #tpu.dot_dimension_numbers<[1], [0], [0], [1], [0, 0, 1, 1], [], []>} : vector<2x32xf32>, vector<32x32xf32>, vector<2x32xf32> -> vector<2x32xf32>
    %123 = arith.addf %122, %28 : vector<2x32xf32>
    %124 = vector.extract_strided_slice %10 {offsets = [0, 3, 0], sizes = [2, 1, 32], strides = [1, 1, 1]} : vector<2x8x32xf32> to vector<2x1x32xf32>
    %125 = vector.shape_cast %124 : vector<2x1x32xf32> to vector<2x32xf32>
    %126 = arith.addf %125, %120 : vector<2x32xf32>
    %127 = arith.negf %126 : vector<2x32xf32>
    %128 = math.exp %127 : vector<2x32xf32>
    %cst_48 = arith.constant 1.000000e+00 : f32
    %129 = vector.broadcast %cst_48 : f32 to vector<2x32xf32>
    %130 = arith.addf %129, %128 : vector<2x32xf32>
    %131 = arith.divf %129, %130 : vector<2x32xf32>
    %132 = vector.extract_strided_slice %16 {offsets = [0, 3, 0], sizes = [2, 1, 32], strides = [1, 1, 1]} : vector<2x8x32xf32> to vector<2x1x32xf32>
    %133 = vector.shape_cast %132 : vector<2x1x32xf32> to vector<2x32xf32>
    %134 = arith.addf %133, %121 : vector<2x32xf32>
    %135 = arith.negf %134 : vector<2x32xf32>
    %136 = math.exp %135 : vector<2x32xf32>
    %cst_49 = arith.constant 1.000000e+00 : f32
    %137 = vector.broadcast %cst_49 : f32 to vector<2x32xf32>
    %138 = arith.addf %137, %136 : vector<2x32xf32>
    %139 = arith.divf %137, %138 : vector<2x32xf32>
    %140 = vector.extract_strided_slice %22 {offsets = [0, 3, 0], sizes = [2, 1, 32], strides = [1, 1, 1]} : vector<2x8x32xf32> to vector<2x1x32xf32>
    %141 = vector.shape_cast %140 : vector<2x1x32xf32> to vector<2x32xf32>
    %142 = arith.mulf %131, %123 : vector<2x32xf32>
    %143 = arith.addf %141, %142 : vector<2x32xf32>
    %144 = math.tanh %143 : vector<2x32xf32>
    %cst_50 = arith.constant 1.000000e+00 : f32
    %145 = vector.broadcast %cst_50 : f32 to vector<2x32xf32>
    %146 = arith.subf %145, %139 : vector<2x32xf32>
    %147 = arith.mulf %146, %144 : vector<2x32xf32>
    %148 = arith.mulf %139, %119 : vector<2x32xf32>
    %149 = arith.addf %147, %148 : vector<2x32xf32>
    %cst_51 = arith.constant dense<0.000000e+00> : vector<2x32xf32>
    %150 = tpu.matmul %149, %23, %cst_51 {dimension_numbers = #tpu.dot_dimension_numbers<[1], [0], [0], [1], [0, 0, 1, 1], [], []>} : vector<2x32xf32>, vector<32x32xf32>, vector<2x32xf32> -> vector<2x32xf32>
    %cst_52 = arith.constant dense<0.000000e+00> : vector<2x32xf32>
    %151 = tpu.matmul %149, %24, %cst_52 {dimension_numbers = #tpu.dot_dimension_numbers<[1], [0], [0], [1], [0, 0, 1, 1], [], []>} : vector<2x32xf32>, vector<32x32xf32>, vector<2x32xf32> -> vector<2x32xf32>
    %cst_53 = arith.constant dense<0.000000e+00> : vector<2x32xf32>
    %152 = tpu.matmul %149, %25, %cst_53 {dimension_numbers = #tpu.dot_dimension_numbers<[1], [0], [0], [1], [0, 0, 1, 1], [], []>} : vector<2x32xf32>, vector<32x32xf32>, vector<2x32xf32> -> vector<2x32xf32>
    %153 = arith.addf %152, %28 : vector<2x32xf32>
    %154 = vector.extract_strided_slice %10 {offsets = [0, 4, 0], sizes = [2, 1, 32], strides = [1, 1, 1]} : vector<2x8x32xf32> to vector<2x1x32xf32>
    %155 = vector.shape_cast %154 : vector<2x1x32xf32> to vector<2x32xf32>
    %156 = arith.addf %155, %150 : vector<2x32xf32>
    %157 = arith.negf %156 : vector<2x32xf32>
    %158 = math.exp %157 : vector<2x32xf32>
    %cst_54 = arith.constant 1.000000e+00 : f32
    %159 = vector.broadcast %cst_54 : f32 to vector<2x32xf32>
    %160 = arith.addf %159, %158 : vector<2x32xf32>
    %161 = arith.divf %159, %160 : vector<2x32xf32>
    %162 = vector.extract_strided_slice %16 {offsets = [0, 4, 0], sizes = [2, 1, 32], strides = [1, 1, 1]} : vector<2x8x32xf32> to vector<2x1x32xf32>
    %163 = vector.shape_cast %162 : vector<2x1x32xf32> to vector<2x32xf32>
    %164 = arith.addf %163, %151 : vector<2x32xf32>
    %165 = arith.negf %164 : vector<2x32xf32>
    %166 = math.exp %165 : vector<2x32xf32>
    %cst_55 = arith.constant 1.000000e+00 : f32
    %167 = vector.broadcast %cst_55 : f32 to vector<2x32xf32>
    %168 = arith.addf %167, %166 : vector<2x32xf32>
    %169 = arith.divf %167, %168 : vector<2x32xf32>
    %170 = vector.extract_strided_slice %22 {offsets = [0, 4, 0], sizes = [2, 1, 32], strides = [1, 1, 1]} : vector<2x8x32xf32> to vector<2x1x32xf32>
    %171 = vector.shape_cast %170 : vector<2x1x32xf32> to vector<2x32xf32>
    %172 = arith.mulf %161, %153 : vector<2x32xf32>
    %173 = arith.addf %171, %172 : vector<2x32xf32>
    %174 = math.tanh %173 : vector<2x32xf32>
    %cst_56 = arith.constant 1.000000e+00 : f32
    %175 = vector.broadcast %cst_56 : f32 to vector<2x32xf32>
    %176 = arith.subf %175, %169 : vector<2x32xf32>
    %177 = arith.mulf %176, %174 : vector<2x32xf32>
    %178 = arith.mulf %169, %149 : vector<2x32xf32>
    %179 = arith.addf %177, %178 : vector<2x32xf32>
    %cst_57 = arith.constant dense<0.000000e+00> : vector<2x32xf32>
    %180 = tpu.matmul %179, %23, %cst_57 {dimension_numbers = #tpu.dot_dimension_numbers<[1], [0], [0], [1], [0, 0, 1, 1], [], []>} : vector<2x32xf32>, vector<32x32xf32>, vector<2x32xf32> -> vector<2x32xf32>
    %cst_58 = arith.constant dense<0.000000e+00> : vector<2x32xf32>
    %181 = tpu.matmul %179, %24, %cst_58 {dimension_numbers = #tpu.dot_dimension_numbers<[1], [0], [0], [1], [0, 0, 1, 1], [], []>} : vector<2x32xf32>, vector<32x32xf32>, vector<2x32xf32> -> vector<2x32xf32>
    %cst_59 = arith.constant dense<0.000000e+00> : vector<2x32xf32>
    %182 = tpu.matmul %179, %25, %cst_59 {dimension_numbers = #tpu.dot_dimension_numbers<[1], [0], [0], [1], [0, 0, 1, 1], [], []>} : vector<2x32xf32>, vector<32x32xf32>, vector<2x32xf32> -> vector<2x32xf32>
    %183 = arith.addf %182, %28 : vector<2x32xf32>
    %184 = vector.extract_strided_slice %10 {offsets = [0, 5, 0], sizes = [2, 1, 32], strides = [1, 1, 1]} : vector<2x8x32xf32> to vector<2x1x32xf32>
    %185 = vector.shape_cast %184 : vector<2x1x32xf32> to vector<2x32xf32>
    %186 = arith.addf %185, %180 : vector<2x32xf32>
    %187 = arith.negf %186 : vector<2x32xf32>
    %188 = math.exp %187 : vector<2x32xf32>
    %cst_60 = arith.constant 1.000000e+00 : f32
    %189 = vector.broadcast %cst_60 : f32 to vector<2x32xf32>
    %190 = arith.addf %189, %188 : vector<2x32xf32>
    %191 = arith.divf %189, %190 : vector<2x32xf32>
    %192 = vector.extract_strided_slice %16 {offsets = [0, 5, 0], sizes = [2, 1, 32], strides = [1, 1, 1]} : vector<2x8x32xf32> to vector<2x1x32xf32>
    %193 = vector.shape_cast %192 : vector<2x1x32xf32> to vector<2x32xf32>
    %194 = arith.addf %193, %181 : vector<2x32xf32>
    %195 = arith.negf %194 : vector<2x32xf32>
    %196 = math.exp %195 : vector<2x32xf32>
    %cst_61 = arith.constant 1.000000e+00 : f32
    %197 = vector.broadcast %cst_61 : f32 to vector<2x32xf32>
    %198 = arith.addf %197, %196 : vector<2x32xf32>
    %199 = arith.divf %197, %198 : vector<2x32xf32>
    %200 = vector.extract_strided_slice %22 {offsets = [0, 5, 0], sizes = [2, 1, 32], strides = [1, 1, 1]} : vector<2x8x32xf32> to vector<2x1x32xf32>
    %201 = vector.shape_cast %200 : vector<2x1x32xf32> to vector<2x32xf32>
    %202 = arith.mulf %191, %183 : vector<2x32xf32>
    %203 = arith.addf %201, %202 : vector<2x32xf32>
    %204 = math.tanh %203 : vector<2x32xf32>
    %cst_62 = arith.constant 1.000000e+00 : f32
    %205 = vector.broadcast %cst_62 : f32 to vector<2x32xf32>
    %206 = arith.subf %205, %199 : vector<2x32xf32>
    %207 = arith.mulf %206, %204 : vector<2x32xf32>
    %208 = arith.mulf %199, %179 : vector<2x32xf32>
    %209 = arith.addf %207, %208 : vector<2x32xf32>
    %cst_63 = arith.constant dense<0.000000e+00> : vector<2x32xf32>
    %210 = tpu.matmul %209, %23, %cst_63 {dimension_numbers = #tpu.dot_dimension_numbers<[1], [0], [0], [1], [0, 0, 1, 1], [], []>} : vector<2x32xf32>, vector<32x32xf32>, vector<2x32xf32> -> vector<2x32xf32>
    %cst_64 = arith.constant dense<0.000000e+00> : vector<2x32xf32>
    %211 = tpu.matmul %209, %24, %cst_64 {dimension_numbers = #tpu.dot_dimension_numbers<[1], [0], [0], [1], [0, 0, 1, 1], [], []>} : vector<2x32xf32>, vector<32x32xf32>, vector<2x32xf32> -> vector<2x32xf32>
    %cst_65 = arith.constant dense<0.000000e+00> : vector<2x32xf32>
    %212 = tpu.matmul %209, %25, %cst_65 {dimension_numbers = #tpu.dot_dimension_numbers<[1], [0], [0], [1], [0, 0, 1, 1], [], []>} : vector<2x32xf32>, vector<32x32xf32>, vector<2x32xf32> -> vector<2x32xf32>
    %213 = arith.addf %212, %28 : vector<2x32xf32>
    %214 = vector.extract_strided_slice %10 {offsets = [0, 6, 0], sizes = [2, 1, 32], strides = [1, 1, 1]} : vector<2x8x32xf32> to vector<2x1x32xf32>
    %215 = vector.shape_cast %214 : vector<2x1x32xf32> to vector<2x32xf32>
    %216 = arith.addf %215, %210 : vector<2x32xf32>
    %217 = arith.negf %216 : vector<2x32xf32>
    %218 = math.exp %217 : vector<2x32xf32>
    %cst_66 = arith.constant 1.000000e+00 : f32
    %219 = vector.broadcast %cst_66 : f32 to vector<2x32xf32>
    %220 = arith.addf %219, %218 : vector<2x32xf32>
    %221 = arith.divf %219, %220 : vector<2x32xf32>
    %222 = vector.extract_strided_slice %16 {offsets = [0, 6, 0], sizes = [2, 1, 32], strides = [1, 1, 1]} : vector<2x8x32xf32> to vector<2x1x32xf32>
    %223 = vector.shape_cast %222 : vector<2x1x32xf32> to vector<2x32xf32>
    %224 = arith.addf %223, %211 : vector<2x32xf32>
    %225 = arith.negf %224 : vector<2x32xf32>
    %226 = math.exp %225 : vector<2x32xf32>
    %cst_67 = arith.constant 1.000000e+00 : f32
    %227 = vector.broadcast %cst_67 : f32 to vector<2x32xf32>
    %228 = arith.addf %227, %226 : vector<2x32xf32>
    %229 = arith.divf %227, %228 : vector<2x32xf32>
    %230 = vector.extract_strided_slice %22 {offsets = [0, 6, 0], sizes = [2, 1, 32], strides = [1, 1, 1]} : vector<2x8x32xf32> to vector<2x1x32xf32>
    %231 = vector.shape_cast %230 : vector<2x1x32xf32> to vector<2x32xf32>
    %232 = arith.mulf %221, %213 : vector<2x32xf32>
    %233 = arith.addf %231, %232 : vector<2x32xf32>
    %234 = math.tanh %233 : vector<2x32xf32>
    %cst_68 = arith.constant 1.000000e+00 : f32
    %235 = vector.broadcast %cst_68 : f32 to vector<2x32xf32>
    %236 = arith.subf %235, %229 : vector<2x32xf32>
    %237 = arith.mulf %236, %234 : vector<2x32xf32>
    %238 = arith.mulf %229, %209 : vector<2x32xf32>
    %239 = arith.addf %237, %238 : vector<2x32xf32>
    %cst_69 = arith.constant dense<0.000000e+00> : vector<2x32xf32>
    %240 = tpu.matmul %239, %23, %cst_69 {dimension_numbers = #tpu.dot_dimension_numbers<[1], [0], [0], [1], [0, 0, 1, 1], [], []>} : vector<2x32xf32>, vector<32x32xf32>, vector<2x32xf32> -> vector<2x32xf32>
    %cst_70 = arith.constant dense<0.000000e+00> : vector<2x32xf32>
    %241 = tpu.matmul %239, %24, %cst_70 {dimension_numbers = #tpu.dot_dimension_numbers<[1], [0], [0], [1], [0, 0, 1, 1], [], []>} : vector<2x32xf32>, vector<32x32xf32>, vector<2x32xf32> -> vector<2x32xf32>
    %cst_71 = arith.constant dense<0.000000e+00> : vector<2x32xf32>
    %242 = tpu.matmul %239, %25, %cst_71 {dimension_numbers = #tpu.dot_dimension_numbers<[1], [0], [0], [1], [0, 0, 1, 1], [], []>} : vector<2x32xf32>, vector<32x32xf32>, vector<2x32xf32> -> vector<2x32xf32>
    %243 = arith.addf %242, %28 : vector<2x32xf32>
    %244 = vector.extract_strided_slice %10 {offsets = [0, 7, 0], sizes = [2, 1, 32], strides = [1, 1, 1]} : vector<2x8x32xf32> to vector<2x1x32xf32>
    %245 = vector.shape_cast %244 : vector<2x1x32xf32> to vector<2x32xf32>
    %246 = arith.addf %245, %240 : vector<2x32xf32>
    %247 = arith.negf %246 : vector<2x32xf32>
    %248 = math.exp %247 : vector<2x32xf32>
    %cst_72 = arith.constant 1.000000e+00 : f32
    %249 = vector.broadcast %cst_72 : f32 to vector<2x32xf32>
    %250 = arith.addf %249, %248 : vector<2x32xf32>
    %251 = arith.divf %249, %250 : vector<2x32xf32>
    %252 = vector.extract_strided_slice %16 {offsets = [0, 7, 0], sizes = [2, 1, 32], strides = [1, 1, 1]} : vector<2x8x32xf32> to vector<2x1x32xf32>
    %253 = vector.shape_cast %252 : vector<2x1x32xf32> to vector<2x32xf32>
    %254 = arith.addf %253, %241 : vector<2x32xf32>
    %255 = arith.negf %254 : vector<2x32xf32>
    %256 = math.exp %255 : vector<2x32xf32>
    %cst_73 = arith.constant 1.000000e+00 : f32
    %257 = vector.broadcast %cst_73 : f32 to vector<2x32xf32>
    %258 = arith.addf %257, %256 : vector<2x32xf32>
    %259 = arith.divf %257, %258 : vector<2x32xf32>
    %260 = vector.extract_strided_slice %22 {offsets = [0, 7, 0], sizes = [2, 1, 32], strides = [1, 1, 1]} : vector<2x8x32xf32> to vector<2x1x32xf32>
    %261 = vector.shape_cast %260 : vector<2x1x32xf32> to vector<2x32xf32>
    %262 = arith.mulf %251, %243 : vector<2x32xf32>
    %263 = arith.addf %261, %262 : vector<2x32xf32>
    %264 = math.tanh %263 : vector<2x32xf32>
    %cst_74 = arith.constant 1.000000e+00 : f32
    %265 = vector.broadcast %cst_74 : f32 to vector<2x32xf32>
    %266 = arith.subf %265, %259 : vector<2x32xf32>
    %267 = arith.mulf %266, %264 : vector<2x32xf32>
    %268 = arith.mulf %259, %239 : vector<2x32xf32>
    %269 = arith.addf %267, %268 : vector<2x32xf32>
    %c0_75 = arith.constant 0 : index
    %c0_76 = arith.constant 0 : index
    %270 = vector.load %arg13[%c0_75, %c0_76] : memref<2x32xf32, #tpu.memory_space<vmem>>, vector<2x32xf32>
    tpu.vector_store %arg13[%c0_75, %c0_76], %269 {strides = array<i32>} : memref<2x32xf32, #tpu.memory_space<vmem>>, vector<2x32xf32>,
    return
  }
  func.func @transform_0(%arg0: i32, %arg1: i32) -> (i32, i32, i32) {
    %c0_i32 = arith.constant 0 : i32
    %c0_i32_0 = arith.constant 0 : i32
    return %arg0, %arg1, %c0_i32 : i32, i32, i32
  }
  func.func @transform_1(%arg0: i32, %arg1: i32) -> (i32, i32) {
    %c0_i32 = arith.constant 0 : i32
    %c0_i32_0 = arith.constant 0 : i32
    %c0_i32_1 = arith.constant 0 : i32
    return %c0_i32, %c0_i32_0 : i32, i32
  }
  func.func @transform_2(%arg0: i32, %arg1: i32) -> (i32, i32) {
    %c0_i32 = arith.constant 0 : i32
    %c0_i32_0 = arith.constant 0 : i32
    %c0_i32_1 = arith.constant 0 : i32
    return %c0_i32, %c0_i32_0 : i32, i32
  }
  func.func @transform_3(%arg0: i32, %arg1: i32) -> (i32, i32) {
    %c0_i32 = arith.constant 0 : i32
    %c0_i32_0 = arith.constant 0 : i32
    %c0_i32_1 = arith.constant 0 : i32
    return %c0_i32, %c0_i32_0 : i32, i32
  }
  func.func @transform_4(%arg0: i32, %arg1: i32) -> (i32, i32) {
    %c0_i32 = arith.constant 0 : i32
    %c0_i32_0 = arith.constant 0 : i32
    %c0_i32_1 = arith.constant 0 : i32
    return %c0_i32, %c0_i32_0 : i32, i32
  }
  func.func @transform_5(%arg0: i32, %arg1: i32) -> (i32, i32) {
    %c0_i32 = arith.constant 0 : i32
    %c0_i32_0 = arith.constant 0 : i32
    %c0_i32_1 = arith.constant 0 : i32
    return %c0_i32, %c0_i32_0 : i32, i32
  }
  func.func @transform_6(%arg0: i32, %arg1: i32) -> (i32, i32) {
    %c0_i32 = arith.constant 0 : i32
    %c0_i32_0 = arith.constant 0 : i32
    %c0_i32_1 = arith.constant 0 : i32
    return %c0_i32, %c0_i32_0 : i32, i32
  }
  func.func @transform_7(%arg0: i32, %arg1: i32) -> (i32, i32) {
    %c0_i32 = arith.constant 0 : i32
    %c0_i32_0 = arith.constant 0 : i32
    %c0_i32_1 = arith.constant 0 : i32
    return %c0_i32, %c0_i32_0 : i32, i32
  }
  func.func @transform_8(%arg0: i32, %arg1: i32) -> (i32, i32) {
    %c0_i32 = arith.constant 0 : i32
    %c0_i32_0 = arith.constant 0 : i32
    %c0_i32_1 = arith.constant 0 : i32
    return %c0_i32, %c0_i32_0 : i32, i32
  }
  func.func @transform_9(%arg0: i32, %arg1: i32) -> (i32, i32) {
    %c0_i32 = arith.constant 0 : i32
    %c0_i32_0 = arith.constant 0 : i32
    %c0_i32_1 = arith.constant 0 : i32
    return %c0_i32, %c0_i32_0 : i32, i32
  }
  func.func @transform_10(%arg0: i32, %arg1: i32) -> (i32, i32) {
    %c0_i32 = arith.constant 0 : i32
    %c0_i32_0 = arith.constant 0 : i32
    %c0_i32_1 = arith.constant 0 : i32
    return %c0_i32, %c0_i32_0 : i32, i32
  }
  func.func @transform_11(%arg0: i32, %arg1: i32) -> (i32, i32) {
    %c0_i32 = arith.constant 0 : i32
    %c0_i32_0 = arith.constant 0 : i32
    return %arg0, %c0_i32 : i32, i32
  }
}

</mosaic_0001>

<bundles_post_ra>
// kernel: tpu_custom_call.1
= control target key start
LH: loop header
LB: loop body
LE: loop exit
PB: predicated region body
PF: predicated region fallthrough
CT: control target
= control target key end

     0   :  { %16 = vsyncpa [#allocation3], 0  ;;  %s4206_s0 = inlined_call_operand.hbm [shape: f32[2,8,16], index: 0, kind: input, shape index: {}]   ;;  %s4207_s1 = inlined_call_operand.hbm [shape: f32[16,32], index: 1, kind: input, shape index: {}]   ;;  %s4208_s2 = inlined_call_operand.hbm [shape: f32[16,32], index: 2, kind: input, shape index: {}]   ;;  %s4209_s3 = inlined_call_operand.hbm [shape: f32[16,32], index: 3, kind: input, shape index: {}]   ;;  %s4210_s4 = inlined_call_operand.hbm [shape: f32[32,32], index: 4, kind: input, shape index: {}]   ;;  %s4211_s5 = inlined_call_operand.hbm [shape: f32[32,32], index: 5, kind: input, shape index: {}]   ;;  %s4212_s6 = inlined_call_operand.hbm [shape: f32[32,32], index: 6, kind: input, shape index: {}]   ;;  %s4213_s7 = inlined_call_operand.vmem [shape: f32[1,32], index: 7, kind: input, shape index: {}]   ;;  %s4214_s8 = inlined_call_operand.vmem [shape: f32[1,32], index: 8, kind: input, shape index: {}]   ;;  %s4215_s9 = inlined_call_operand.vmem [shape: f32[1,32], index: 9, kind: input, shape index: {}]   ;;  %s4216_s10 = inlined_call_operand.vmem [shape: f32[1,32], index: 10, kind: input, shape index: {}]   ;;  %s4217_s11 = inlined_call_operand.hbm [shape: f32[2,32], index: 11, kind: output, shape index: {}]  }
   0x1   :  { %17 = vsyncpa [#allocation6], 0 }
   0x2   :  { %18 = vsyncpa [#allocation9], 0 }
   0x3   :  { %19 = vsyncpa [#allocation12], 0 }
   0x4   :  { %20 = vsyncpa [#allocation4], 0  ;;  %s3659_s17 = smov [#allocation5]   ;;  %s3660_s19 = smov [#allocation8]  }
   0x5   :  { %s38_s18 = sshll.u32 %s3659_s17, 4  ;;  %s62_s20 = sshll.u32 %s3660_s19, 4  ;;  %s39_s18 = int_to_ptr.vmem [resolvable:$true] %s38_s18  ;;  %s3732_s20 = int_to_ptr.vmem [resolvable:$true] %s62_s20 }
   0x6   :  { %s3473_s23 = scalar_lea.hbm %s4207_s1, 256 }
   0x7   :  { %p3474_p0 = scmp.ne.s32.totalorder %s4207_s1, %s3473_s23  ;;  %p3477_p1 = scmp.lt.u32.totalorder %s3473_s23, %s4207_s1 }
   0x9   :  { %p3479_p2 = pnand %p3477_p1, %p3474_p0 }
   0xb   :  { %3482 = shalt.err (!%p3479_p2)
}
   0xc   :  { %s3483_s28 = scalar_lea.vmem %s39_s18, 256  ;;  %p3488_p4 = scmp.lt.s32.totalorder %s39_s18, %s39_s18 }
   0xd   :  { %p3484_p3 = scmp.ne.s32.totalorder %s39_s18, %s3483_s28  ;;  %p3489_p5 = scmp.lt.s32.totalorder %s3483_s28, %s3483_s28 }
   0xf   :  { %p3490_p6 = por %p3489_p5, %p3488_p4 }
  0x11   :  { %p3491_p7 = pnand %p3490_p6, %p3484_p3 }
  0x13   :  { %3494 = shalt.err (!%p3491_p7)
}
  0x14   :  { %s3661_s29 = smov 128   ;;  %s3662_s30 = smov 8  }
  0x15   :  { %44 = dma.hbm_to_vmem [thread:$0]  %s4207_s1, 256, %s39_s18, [#allocation6], %s3661_s29, %s3661_s29, %s3662_s30  }
  0x16   :  { %s3495_s16 = scalar_lea.hbm %s4209_s3, 256 }
  0x17   :  { %p3496_p8 = scmp.ne.s32.totalorder %s4209_s3, %s3495_s16  ;;  %p3499_p9 = scmp.lt.u32.totalorder %s3495_s16, %s4209_s3 }
  0x19   :  { %p3501_p10 = pnand %p3499_p9, %p3496_p8 }
  0x1b   :  { %3504 = shalt.err (!%p3501_p10)
}
  0x1c   :  { %s3505_s23 = scalar_lea.vmem %s3732_s20, 256  ;;  %p3510_p12 = scmp.lt.s32.totalorder %s3732_s20, %s3732_s20 }
  0x1d   :  { %p3506_p11 = scmp.ne.s32.totalorder %s3732_s20, %s3505_s23  ;;  %p3511_p13 = scmp.lt.s32.totalorder %s3505_s23, %s3505_s23 }
  0x1f   :  { %p3512_p0 = por %p3511_p13, %p3510_p12 }
  0x21   :  { %p3513_p1 = pnand %p3512_p0, %p3506_p11 }
  0x23   :  { %3516 = shalt.err (!%p3513_p1)
}
  0x24   :  { %68 = dma.hbm_to_vmem [thread:$0]  %s4209_s3, 256, %s3732_s20, [#allocation9], %s3661_s29, %s3661_s29, %s3662_s30  }
  0x25   :  { %s3663_s24 = smov [#allocation11]   ;;  %s3664_s26 = smov [#allocation2]  }
  0x26   :  { %s86_s25 = sshll.u32 %s3663_s24, 4  ;;  %s26_s27 = sshll.u32 %s3664_s26, 4  ;;  %s87_s25 = int_to_ptr.vmem [resolvable:$true] %s86_s25  ;;  %s3769_s27 = int_to_ptr.vmem [resolvable:$true] %s26_s27 }
  0x27   :  { %s3517_s13 = scalar_lea.hbm %s4211_s5, 512 }
  0x28   :  { %p3518_p2 = scmp.ne.s32.totalorder %s4211_s5, %s3517_s13  ;;  %p3521_p3 = scmp.lt.u32.totalorder %s3517_s13, %s4211_s5 }
  0x2a   :  { %p3523_p4 = pnand %p3521_p3, %p3518_p2 }
  0x2c   :  { %3526 = shalt.err (!%p3523_p4)
}
  0x2d   :  { %s3527_s3 = scalar_lea.vmem %s87_s25, 512  ;;  %p3532_p6 = scmp.lt.s32.totalorder %s87_s25, %s87_s25 }
  0x2e   :  { %p3528_p5 = scmp.ne.s32.totalorder %s87_s25, %s3527_s3  ;;  %p3533_p7 = scmp.lt.s32.totalorder %s3527_s3, %s3527_s3 }
  0x30   :  { %p3534_p8 = por %p3533_p7, %p3532_p6 }
  0x32   :  { %p3535_p9 = pnand %p3534_p8, %p3528_p5 }
  0x34   :  { %3538 = shalt.err (!%p3535_p9)
}
  0x35   :  { %92 = dma.hbm_to_vmem [thread:$0]  %s4211_s5, 512, %s87_s25, [#allocation12], %s3661_s29, %s3661_s29, %s3662_s30  }
  0x36   :  { %s3539_s23 = scalar_lea.hbm %s4206_s0, 256 }
  0x37   :  { %p3540_p10 = scmp.ne.s32.totalorder %s4206_s0, %s3539_s23  ;;  %p3543_p11 = scmp.lt.u32.totalorder %s3539_s23, %s4206_s0 }
  0x39   :  { %p3545_p12 = pnand %p3543_p11, %p3540_p10 }
  0x3b   :  { %3548 = shalt.err (!%p3545_p12)
}
  0x3c   :  { %s3549_s28 = scalar_lea.vmem %s3769_s27, 256  ;;  %p3554_p0 = scmp.lt.s32.totalorder %s3769_s27, %s3769_s27 }
  0x3d   :  { %p3550_p13 = scmp.ne.s32.totalorder %s3769_s27, %s3549_s28  ;;  %p3555_p1 = scmp.lt.s32.totalorder %s3549_s28, %s3549_s28 }
  0x3f   :  { %p3556_p2 = por %p3555_p1, %p3554_p0 }
  0x41   :  { %p3557_p3 = pnand %p3556_p2, %p3550_p13 }
  0x43   :  { %3560 = shalt.err (!%p3557_p3)
}
  0x44   :  { %32 = dma.hbm_to_vmem [thread:$0]  %s4206_s0, 256, %s3769_s27, [#allocation3], %s3661_s29, %s3661_s29, %s3662_s30  }
  0x45   :  { %s3665_s12 = smov [#allocation7]   ;;  %s3666_s14 = smov [#allocation10]  }
  0x46   :  { %s50_s13 = sshll.u32 %s3665_s12, 4  ;;  %s74_s15 = sshll.u32 %s3666_s14, 4  ;;  %s51_s13 = int_to_ptr.vmem [resolvable:$true] %s50_s13  ;;  %s3806_s15 = int_to_ptr.vmem [resolvable:$true] %s74_s15 }
  0x47   :  { %s3561_s3 = scalar_lea.hbm %s4208_s2, 256 }
  0x48   :  { %p3562_p4 = scmp.ne.s32.totalorder %s4208_s2, %s3561_s3  ;;  %p3565_p5 = scmp.lt.u32.totalorder %s3561_s3, %s4208_s2 }
  0x4a   :  { %p3567_p6 = pnand %p3565_p5, %p3562_p4 }
  0x4c   :  { %3570 = shalt.err (!%p3567_p6)
}
  0x4d   :  { %s3571_s0 = scalar_lea.vmem %s51_s13, 256  ;;  %p3576_p8 = scmp.lt.s32.totalorder %s51_s13, %s51_s13 }
  0x4e   :  { %p3572_p7 = scmp.ne.s32.totalorder %s51_s13, %s3571_s0  ;;  %p3577_p9 = scmp.lt.s32.totalorder %s3571_s0, %s3571_s0 }
  0x50   :  { %p3578_p10 = por %p3577_p9, %p3576_p8 }
  0x52   :  { %p3579_p11 = pnand %p3578_p10, %p3572_p7 }
  0x54   :  { %3582 = shalt.err (!%p3579_p11)
}
  0x55   :  { %56 = dma.hbm_to_vmem [thread:$0]  %s4208_s2, 256, %s51_s13, [#allocation6], %s3661_s29, %s3661_s29, %s3662_s30  }
  0x56   :  { %s3583_s24 = scalar_lea.hbm %s4210_s4, 512 }
  0x57   :  { %p3584_p12 = scmp.ne.s32.totalorder %s4210_s4, %s3583_s24  ;;  %p3587_p13 = scmp.lt.u32.totalorder %s3583_s24, %s4210_s4 }
  0x59   :  { %p3589_p0 = pnand %p3587_p13, %p3584_p12 }
  0x5b   :  { %3592 = shalt.err (!%p3589_p0)
}
  0x5c   :  { %s3593_s12 = scalar_lea.vmem %s3806_s15, 512  ;;  %p3598_p2 = scmp.lt.s32.totalorder %s3806_s15, %s3806_s15 }
  0x5d   :  { %p3594_p1 = scmp.ne.s32.totalorder %s3806_s15, %s3593_s12  ;;  %p3599_p3 = scmp.lt.s32.totalorder %s3593_s12, %s3593_s12 }
  0x5f   :  { %p3600_p4 = por %p3599_p3, %p3598_p2 }
  0x61   :  { %p3601_p5 = pnand %p3600_p4, %p3594_p1 }
  0x63   :  { %3604 = shalt.err (!%p3601_p5)
}
  0x64   :  { %80 = dma.hbm_to_vmem [thread:$0]  %s4210_s4, 512, %s3806_s15, [#allocation9], %s3661_s29, %s3661_s29, %s3662_s30  }
  0x65   :  { %s3667_s14 = smov [#allocation13]   ;;  %s3605_s20 = scalar_lea.hbm %s4212_s6, 512 }
  0x66   :  { %s98_s16 = sshll.u32 %s3667_s14, 4  ;;  %p3606_p6 = scmp.ne.s32.totalorder %s4212_s6, %s3605_s20  ;;  %s99_s16 = int_to_ptr.vmem [resolvable:$true] %s98_s16 }
  0x67   :  { %p3609_p7 = scmp.lt.u32.totalorder %s3605_s20, %s4212_s6 }
  0x69   :  { %p3611_p8 = pnand %p3609_p7, %p3606_p6 }
  0x6b   :  { %3614 = shalt.err (!%p3611_p8)
}
  0x6c   :  { %s3615_s27 = scalar_lea.vmem %s99_s16, 512  ;;  %p3620_p10 = scmp.lt.s32.totalorder %s99_s16, %s99_s16 }
  0x6d   :  { %p3616_p9 = scmp.ne.s32.totalorder %s99_s16, %s3615_s27  ;;  %p3621_p11 = scmp.lt.s32.totalorder %s3615_s27, %s3615_s27 }
  0x6f   :  { %p3622_p12 = por %p3621_p11, %p3620_p10 }
  0x71   :  { %p3623_p13 = pnand %p3622_p12, %p3616_p9 }
  0x73   :  { %3626 = shalt.err (!%p3623_p13)
}
  0x74   :  { %104 = dma.hbm_to_vmem [thread:$0]  %s4212_s6, 512, %s99_s16, [#allocation12], %s3661_s29, %s3661_s29, %s3662_s30  }
  0x75   :  { %3649 = dma.done.wait [#allocation3], 256  }
  0x76   :  { %3650 = vsyncadd [#allocation3], 4294967040 }
  0x77   :  { %3651 = dma.done.wait [#allocation6], 512  }
  0x78   :  { %3652 = vsyncadd [#allocation6], 4294966784 }
  0x79   :  { %3653 = dma.done.wait [#allocation9], 768  }
  0x7a   :  { %3654 = vsyncadd [#allocation9], 4294966528 }
  0x7b   :  { %3655 = dma.done.wait [#allocation12], 1024  }
  0x7c   :  { %3656 = vsyncadd [#allocation12], 4294966272  ;;  %vm138_vm0 = vcmask 254976   ;;  %v3668_v0 = vmov 0.0   ;;  %vm151_vm1 = vcmask 130048   ;;  %v142_v1 = vld [vmem:[#allocation5] sm:$0xff] }
  0x7d   :  { %139 = vst.msk [vmem:[#allocation14] sm:$0x3] %vm138_vm0, %v3668_v0  ;;  %v143_v2 = vld [vmem:[#allocation5 + $0x8] sm:$0xff]  ;;  %v233_v3 = vld [vmem:[#allocation7] sm:$0xff]  ;;  %v234_v5 = vld [vmem:[#allocation7 + $0x8] sm:$0xff]  ;;  %v3669_v17 = vmov 0.0|0.0  }
  0x7e   :  { %v3143_v4 = vpack.c.bf16 %v143_v2, %v142_v1  ;;  %v140_v6 = vld [vmem:[#allocation2] sm:$0xff]  ;;  %v3147_v7 = vpack.c.bf16 %v234_v5, %v233_v3  ;;  %v317_v8 = vld [vmem:[#allocation8] sm:$0xff]  ;;  %v318_v9 = vld [vmem:[#allocation8 + $0x8] sm:$0xff]  ;;  %vm3670_vm2 = vmmov 0   ;;  %vm421_vm3 = vcmask 261120  }
  0x7f   :  { %2869 = vmatprep.mubr.msk.f32.mxu1 %vm151_vm1, %v140_v6  ;;  %2862 = vmatprep.mubr.msk.f32.mxu0 %vm151_vm1, %v140_v6  ;;  %v401_v10 = vld [vmem:[#allocation10] sm:$0xff]  ;;  %v3151_v11 = vpack.c.bf16 %v318_v9, %v317_v8  ;;  %v402_v12 = vld [vmem:[#allocation10 + $0x8] sm:$0xff]  ;;  %v403_v18 = vld [vmem:[#allocation10 + $0x10] sm:$0xff]  ;;  %vm695_vm4 = vcmask 1041409   ;;  %vm2638_vm5 = vcmask 261127   ;;  %vm2640_vm6 = vcmask 253952  }
  0x80   :  { %3144 = vmatprep.subr.bf16.mxu0 %v3143_v4  ;;  %3148 = vmatprep.subr.bf16.mxu1 %v3147_v7  ;;  %v141_v13 = vld [vmem:[#allocation2 + $0x8] sm:$0xff]  ;;  %v3861_v14 = vpack.c.bf16 %v402_v12, %v401_v10  ;;  %v405_v15 = vld [vmem:[#allocation11] sm:$0xff]  ;;  %v404_v19 = vld [vmem:[#allocation10 + $0x18] sm:$0xff] }
  0x81   :  { %3146 = vmatpush3.bf16.msra.mxu0 %v3143_v4  ;;  %3150 = vmatpush3.bf16.msra.mxu1 %v3147_v7  ;;  %v406_v16 = vld [vmem:[#allocation11 + $0x8] sm:$0xff]  ;;  %v3870_v21 = vpack.c.bf16 %v404_v19, %v403_v18  ;;  %v407_v22 = vld [vmem:[#allocation11 + $0x10] sm:$0xff]  ;;  %v408_v23 = vld [vmem:[#allocation11 + $0x18] sm:$0xff] }
  0x82   :  { %3152 = vmatprep.subr.bf16.mxu0 %v3151_v11  ;;  %3155 = vmatprep.subr.bf16.mxu1 %v3669_v17  ;;  %v3866_v20 = vpack.c.bf16 %v406_v16, %v405_v15  ;;  %v409_v24 = vld [vmem:[#allocation13] sm:$0xff]  ;;  %v410_v25 = vld [vmem:[#allocation13 + $0x8] sm:$0xff]  ;;  %v3878_v26 = vpack.c.bf16 %v408_v23, %v407_v22  ;;  %v411_v29 = vld [vmem:[#allocation13 + $0x10] sm:$0xff] }
  0x83   :  { %v3886_v28 = vpack.c.bf16 %v410_v25, %v409_v24  ;;  %v412_v30 = vld [vmem:[#allocation13 + $0x18] sm:$0xff]  ;;  %v2660_v36 = vld [vmem:[%s4213_s7] ss:$0 sm:$0xff] }
  0x84   :  { %2863 = vmatmul.mubr.msk.f32.vlgmr.msra.gmra.mrb[0].mxu0 %vm151_vm1, %v141_v13  ;;  %2870 = vmatmul.mubr.msk.f32.vlgmr.msra.gmra.mrb[0].mxu1 %vm151_vm1, %v141_v13  ;;  %v3883_v27 = vld [vmem:[#allocation14] sm:$0x3]  ;;  %v3893_v31 = vpack.c.bf16 %v412_v30, %v411_v29 }
  0x85   :  { %3154 = vmatpush3.bf16.msra.mxu0 %v3151_v11  ;;  %3157 = vmatpush3.bf16.msra.mxu1 %v3861_v14  ;;  %v2663_v40 = vld [vmem:[%s4214_s8] ss:$0 sm:$0xff]  ;;  %v685_v24 = vrot.slane %v3883_v27, 1 }
  0x86   :  { %2876 = vmatprep.mubr.msk.f32.mxu0 %vm151_vm1, %v140_v6  ;;  %3158 = vmatprep.subr.bf16.mxu1 %v3669_v17  ;;  %v3938_v1 = vld [vmem:[%s4216_s10] ss:$0 sm:$0xff] }
  0x87   :  { %3161 = vmatprep.subr.bf16.mxu0 %v3669_v17  ;;  %2887 = vmatprep.mubr.msk.f32.mxu1 %vm3670_vm2, %v3668_v0  ;;  %v2666_v6 = vld [vmem:[%s4215_s9] ss:$0 sm:$0xff] }
  0x88   :  { %2877 = vmatmul.mubr.msk.f32.vlgmr.msra.gmra.mrb[2].mxu0 %vm151_vm1, %v141_v13 }
  0x89   :  { %3163 = vmatpush3.bf16.msra.mxu0 %v3866_v20  ;;  %2898 = vmatprep.mubr.msk.f32.mxu0 %vm3670_vm2, %v3668_v0 }
  0x8a   :  { %3160 = vmatpush3.bf16.msra.mxu1 %v3870_v21  ;;  %3164 = vmatprep.subr.bf16.mxu0 %v3669_v17 }
  0x8b   :  { %3167 = vmatprep.subr.bf16.mxu1 %v3669_v17 }
  0x8d   :  { %2888 = vmatmul.mubr.msk.f32.vlgmr.msra.gmra.mrb[2].mxu1 %vm421_vm3, %v3883_v27  ;;  %3166 = vmatpush3.bf16.msra.mxu0 %v3878_v26 }
  0x8e   :  { %3169 = vmatpush3.bf16.msra.mxu1 %v3886_v28  ;;  %2909 = vmatprep.mubr.msk.f32.mxu1 %vm3670_vm2, %v3668_v0 }
  0x8f   :  { %3170 = vmatprep.subr.bf16.mxu1 %v3669_v17  ;;  %3173 = vmatprep.subr.bf16.mxu0 %v3669_v17 }
  0x90   :  { %2899 = vmatmul.mubr.msk.f32.vlgmr.msra.gmra.mrb[4].mxu0 %vm421_vm3, %v3883_v27 }
  0x91   :  { %3175 = vmatpush3.bf16.msra.mxu0 %v3861_v14  ;;  %2920 = vmatprep.mubr.msk.f32.mxu0 %vm3670_vm2, %v3668_v0 }
  0x92   :  { %3172 = vmatpush3.bf16.msra.mxu1 %v3893_v31  ;;  %3176 = vmatprep.subr.bf16.mxu0 %v3669_v17 }
  0x93   :  { %3179 = vmatprep.subr.bf16.mxu1 %v3669_v17 }
  0x95   :  { %2910 = vmatmul.mubr.msk.f32.vlgmr.msra.gmra.mrb[4].mxu1 %vm421_vm3, %v3883_v27  ;;  %3178 = vmatpush3.bf16.msra.mxu0 %v3870_v21 }
  0x96   :  { %3181 = vmatpush3.bf16.msra.mxu1 %v3866_v20  ;;  %2931 = vmatprep.mubr.msk.f32.mxu1 %vm3670_vm2, %v3668_v0 }
  0x97   :  { %3182 = vmatprep.subr.bf16.mxu1 %v3669_v17  ;;  %3185 = vmatprep.subr.bf16.mxu0 %v3669_v17 }
  0x9a   :  { %3184 = vmatpush3.bf16.msra.mxu1 %v3878_v26 }
  0x9b   :  { %3191 = vmatprep.subr.bf16.mxu1 %v3669_v17 }
 0x157   :  { %v2864_v32 = vpop.f32.mrb[0].mxu0  ;;  %v2871_v33 = vpop.f32.mrb[0].mxu1 }
 0x158   :  { %v224_v34 = vpop.f32.mrb[1].mxu0  ;;  %v308_v35 = vpop.f32.mrb[1].mxu1  ;;  %v3925_v41 = vadd.f32 %v2864_v32, %v2660_v36  ;;  %v3931_v50 = vadd.f32 %v2871_v33, %v2663_v40 }
 0x159   :  { %v3920_v39 = vadd.f32 %v2660_v36, %v224_v34  ;;  %v3928_v46 = vadd.f32 %v2663_v40, %v308_v35 }
 0x15b   :  { %v2878_v37 = vpop.f32.mrb[2].mxu0 }
 0x15c   :  { %v392_v38 = vpop.f32.mrb[3].mxu0  ;;  %v3946_v13 = vadd.f32 %v2878_v37, %v2666_v6 }
 0x15d   :  { %v3944_v10 = vadd.f32 %v2666_v6, %v392_v38 }
 0x160   :  { %v491_v42 = vpop.f32.mrb[2].mxu1 }
 0x161   :  { %v636_v43 = vrot.slane %v491_v42, 1  ;;  %v639_v44 = vadd.f32 %v491_v42, %v3920_v39  ;;  %v2889_v45 = vpop.f32.mrb[3].mxu1 }
 0x163   :  { %v640_v47 = vadd.f32 %v636_v43, %v3925_v41  ;;  %v2673_v48 = vmul.f32 -1.442695, %v639_v44  ;;  %v561_v49 = vpop.f32.mrb[4].mxu0 }
 0x164   :  { %v654_v51 = vrot.slane %v561_v49, 1  ;;  %v657_v52 = vadd.f32 %v561_v49, %v3928_v46  ;;  %v2900_v53 = vpop.f32.mrb[5].mxu0 }
 0x165   :  { %3312 = vpow2.f32 %v2673_v48  ;;  %v2674_v54 = vmul.f32 -1.442695, %v640_v47 }
 0x166   :  { %v658_v55 = vadd.f32 %v654_v51, %v3931_v50  ;;  %v2675_v56 = vmul.f32 -1.442695, %v657_v52 }
 0x167   :  { %3314 = vpow2.f32 %v2674_v54 }
 0x168   :  { %v631_v57 = vpop.f32.mrb[4].mxu1  ;;  %v2676_v59 = vmul.f32 -1.442695, %v658_v55  ;;  %3316 = vpow2.f32 %v2675_v56 }
 0x169   :  { %v2911_v58 = vpop.f32.mrb[5].mxu1  ;;  %v632_v3 = vadd.f32 %v3938_v1, %v631_v57 }
 0x16a   :  { %3318 = vpow2.f32 %v2676_v59 }
 0x16b   :  { %v672_v8 = vrot.slane %v632_v3, 1 }
 0x16f   :  { %v3313_v60 = vpop.eup %3312 }
 0x170   :  { %v647_v61 = vadd.f32 1.0, %v3313_v60 }
 0x171   :  { %v3315_v62 = vpop.eup %3314 }
 0x172   :  { %v648_v63 = vadd.f32 1.0, %v3315_v62  ;;  %3320 = vrcp.f32 %v647_v61  ;;  %v3317_v2 = vpop.eup %3316 }
 0x173   :  { %v665_v5 = vadd.f32 1.0, %v3317_v2 }
 0x174   :  { %3322 = vrcp.f32 %v648_v63  ;;  %v3319_v4 = vpop.eup %3318 }
 0x175   :  { %v666_v7 = vadd.f32 1.0, %v3319_v4  ;;  %3324 = vrcp.f32 %v665_v5 }
 0x177   :  { %3326 = vrcp.f32 %v666_v7 }
 0x17c   :  { %v3321_v9 = vpop.eup %3320 }
 0x17d   :  { %v675_v11 = vmul.f32 %v3321_v9, %v632_v3 }
 0x17e   :  { %v3323_v12 = vpop.eup %3322 }
 0x17f   :  { %v676_v15 = vmul.f32 %v3323_v12, %v672_v8  ;;  %v677_v16 = vadd.f32 %v675_v11, %v3944_v10  ;;  %v3325_v19 = vpop.eup %3324 }
 0x180   :  { %v681_v23 = vsub.f32 1.0, %v3325_v19  ;;  %v688_v32 = vmul.f32 %v3325_v19, %v3883_v27 }
 0x181   :  { %v678_v18 = vadd.f32 %v676_v15, %v3946_v13  ;;  %3328 = vtanh.f32 %v677_v16  ;;  %v3327_v22 = vpop.eup %3326 }
 0x182   :  { %v682_v29 = vsub.f32 1.0, %v3327_v22  ;;  %v689_v35 = vmul.f32 %v3327_v22, %v685_v24 }
 0x183   :  { %3330 = vtanh.f32 %v678_v18 }
 0x18b   :  { %v3329_v25 = vpop.eup %3328 }
 0x18c   :  { %v683_v30 = vmul.f32 %v3329_v25, %v681_v23 }
 0x18d   :  { %v3331_v33 = vpop.eup %3330 }
 0x18e   :  { %v684_v34 = vmul.f32 %v3331_v33, %v682_v29  ;;  %v3952_v36 = vadd.f32 %v688_v32, %v683_v30 }
 0x190   :  { %v3954_v37 = vadd.f32 %v689_v35, %v684_v34  ;;  %v959_v11 = vrot.slane %v3952_v36, 7 }
 0x192   :  { %v694_v38 = vrot.slane %v3954_v37, 7 }
 0x194   :  { %v696_v40 = vsel %vm695_vm4, %v694_v38, %v3952_v36 }
 0x195   :  { %2921 = vmatmul.mubr.msk.f32.vlgmr.msra.gmra.mrb[6].mxu0 %vm421_vm3, %v696_v40  ;;  %2932 = vmatmul.mubr.msk.f32.vlgmr.msra.gmra.mrb[6].mxu1 %vm421_vm3, %v696_v40 }
 0x196   :  { %3187 = vmatpush3.bf16.msra.mxu0 %v3886_v28  ;;  %2942 = vmatprep.mubr.msk.f32.mxu0 %vm3670_vm2, %v3668_v0 }
 0x197   :  { %3188 = vmatprep.subr.bf16.mxu0 %v3669_v17  ;;  %3193 = vmatpush3.bf16.msra.mxu1 %v3861_v14 }
 0x198   :  { %3194 = vmatprep.subr.bf16.mxu1 %v3669_v17  ;;  %2953 = vmatprep.mubr.msk.f32.mxu1 %vm3670_vm2, %v3668_v0 }
 0x19a   :  { %3190 = vmatpush3.bf16.msra.mxu0 %v3893_v31 }
 0x19b   :  { %3197 = vmatprep.subr.bf16.mxu0 %v3669_v17  ;;  %3196 = vmatpush3.bf16.msra.mxu1 %v3870_v21 }
 0x19c   :  { %3203 = vmatprep.subr.bf16.mxu1 %v3669_v17 }
 0x19d   :  { %2943 = vmatmul.mubr.msk.f32.vlgmr.msra.gmra.mrb[8].mxu0 %vm421_vm3, %v696_v40 }
 0x19e   :  { %3199 = vmatpush3.bf16.msra.mxu0 %v3866_v20  ;;  %2964 = vmatprep.mubr.msk.f32.mxu0 %vm3670_vm2, %v3668_v0 }
 0x19f   :  { %3200 = vmatprep.subr.bf16.mxu0 %v3669_v17 }
 0x1a2   :  { %3202 = vmatpush3.bf16.msra.mxu0 %v3878_v26 }
 0x1a3   :  { %3209 = vmatprep.subr.bf16.mxu0 %v3669_v17 }
 0x268   :  { %v765_v27 = vpop.f32.mrb[6].mxu0  ;;  %v835_v42 = vpop.f32.mrb[6].mxu1 }
 0x269   :  { %v910_v43 = vrot.slane %v765_v27, 7  ;;  %v914_v44 = vadd.f32 %v765_v27, %v3925_v41  ;;  %v928_v45 = vrot.slane %v835_v42, 7  ;;  %v2922_v47 = vpop.f32.mrb[7].mxu0  ;;  %v2933_v48 = vpop.f32.mrb[7].mxu1  ;;  %v932_v53 = vadd.f32 %v835_v42, %v3931_v50 }
 0x26b   :  { %v913_v49 = vadd.f32 %v910_v43, %v3920_v39  ;;  %v2681_v51 = vmul.f32 -1.442695, %v914_v44  ;;  %v931_v52 = vadd.f32 %v928_v45, %v3928_v46  ;;  %v2683_v56 = vmul.f32 -1.442695, %v932_v53 }
 0x26d   :  { %v2680_v54 = vmul.f32 -1.442695, %v913_v49  ;;  %3332 = vpow2.f32 %v2681_v51  ;;  %v2682_v55 = vmul.f32 -1.442695, %v931_v52 }
 0x26f   :  { %3334 = vpow2.f32 %v2680_v54 }
 0x270   :  { %3336 = vpow2.f32 %v2682_v55  ;;  %v905_v57 = vpop.f32.mrb[8].mxu0 }
 0x271   :  { %v2944_v58 = vpop.f32.mrb[9].mxu0  ;;  %3338 = vpow2.f32 %v2683_v56  ;;  %v906_v5 = vadd.f32 %v3938_v1, %v905_v57 }
 0x273   :  { %v946_v7 = vrot.slane %v906_v5, 7 }
 0x277   :  { %v3333_v59 = vpop.eup %3332 }
 0x278   :  { %v922_v60 = vadd.f32 1.0, %v3333_v59 }
 0x279   :  { %v3335_v61 = vpop.eup %3334 }
 0x27a   :  { %v3337_v62 = vpop.eup %3336  ;;  %v921_v63 = vadd.f32 1.0, %v3335_v61  ;;  %3340 = vrcp.f32 %v922_v60 }
 0x27b   :  { %v939_v2 = vadd.f32 1.0, %v3337_v62  ;;  %v3339_v3 = vpop.eup %3338 }
 0x27c   :  { %3342 = vrcp.f32 %v921_v63  ;;  %v940_v4 = vadd.f32 1.0, %v3339_v3 }
 0x27d   :  { %3344 = vrcp.f32 %v939_v2 }
 0x27e   :  { %3346 = vrcp.f32 %v940_v4 }
 0x284   :  { %v3341_v6 = vpop.eup %3340 }
 0x285   :  { %v950_v8 = vmul.f32 %v3341_v6, %v906_v5 }
 0x286   :  { %v3343_v9 = vpop.eup %3342 }
 0x287   :  { %v3345_v12 = vpop.eup %3344  ;;  %v949_v15 = vmul.f32 %v3343_v9, %v946_v7  ;;  %v952_v16 = vadd.f32 %v950_v8, %v3946_v13 }
 0x288   :  { %v962_v18 = vmul.f32 %v3345_v12, %v959_v11  ;;  %v3347_v22 = vpop.eup %3346  ;;  %v955_v25 = vsub.f32 1.0, %v3345_v12 }
 0x289   :  { %v951_v19 = vadd.f32 %v949_v15, %v3944_v10  ;;  %3348 = vtanh.f32 %v952_v16  ;;  %v956_v23 = vsub.f32 1.0, %v3347_v22  ;;  %v963_v30 = vmul.f32 %v3347_v22, %v694_v38 }
 0x28b   :  { %3350 = vtanh.f32 %v951_v19 }
 0x293   :  { %v3349_v24 = vpop.eup %3348 }
 0x294   :  { %v958_v29 = vmul.f32 %v3349_v24, %v956_v23 }
 0x295   :  { %v3351_v32 = vpop.eup %3350 }
 0x296   :  { %v957_v33 = vmul.f32 %v3351_v32, %v955_v25  ;;  %v3992_v34 = vadd.f32 %v963_v30, %v958_v29 }
 0x298   :  { %v3994_v35 = vadd.f32 %v962_v18, %v957_v33  ;;  %v1236_v16 = vrot.slane %v3992_v34, 7 }
 0x29a   :  { %v968_v36 = vrot.slane %v3994_v35, 1  ;;  %v1235_v11 = vrot.slane %v3994_v35, 7 }
 0x29c   :  { %v969_v40 = vsel %vm695_vm4, %v3992_v34, %v968_v36 }
 0x29d   :  { %2954 = vmatmul.mubr.msk.f32.vlgmr.msra.gmra.mrb[8].mxu1 %vm421_vm3, %v969_v40  ;;  %2965 = vmatmul.mubr.msk.f32.vlgmr.msra.gmra.mrb[10].mxu0 %vm421_vm3, %v969_v40 }
 0x29e   :  { %3205 = vmatpush3.bf16.msra.mxu1 %v3886_v28  ;;  %2975 = vmatprep.mubr.msk.f32.mxu1 %vm3670_vm2, %v3668_v0 }
 0x29f   :  { %3206 = vmatprep.subr.bf16.mxu1 %v3669_v17  ;;  %3211 = vmatpush3.bf16.msra.mxu0 %v3861_v14 }
 0x2a0   :  { %3212 = vmatprep.subr.bf16.mxu0 %v3669_v17  ;;  %2986 = vmatprep.mubr.msk.f32.mxu0 %vm3670_vm2, %v3668_v0 }
 0x2a2   :  { %3208 = vmatpush3.bf16.msra.mxu1 %v3893_v31 }
 0x2a3   :  { %3215 = vmatprep.subr.bf16.mxu1 %v3669_v17  ;;  %3214 = vmatpush3.bf16.msra.mxu0 %v3870_v21 }
 0x2a4   :  { %3221 = vmatprep.subr.bf16.mxu0 %v3669_v17 }
 0x2a5   :  { %2976 = vmatmul.mubr.msk.f32.vlgmr.msra.gmra.mrb[10].mxu1 %vm421_vm3, %v969_v40 }
 0x2a6   :  { %3217 = vmatpush3.bf16.msra.mxu1 %v3866_v20  ;;  %2997 = vmatprep.mubr.msk.f32.mxu1 %vm3670_vm2, %v3668_v0 }
 0x2a7   :  { %3218 = vmatprep.subr.bf16.mxu1 %v3669_v17 }
 0x2aa   :  { %3220 = vmatpush3.bf16.msra.mxu1 %v3878_v26 }
 0x2ab   :  { %3227 = vmatprep.subr.bf16.mxu1 %v3669_v17 }
 0x370   :  { %v1038_v37 = vpop.f32.mrb[8].mxu1  ;;  %v1108_v38 = vpop.f32.mrb[10].mxu0 }
 0x371   :  { %v1183_v27 = vrot.slane %v1038_v37, 6  ;;  %v1184_v42 = vrot.slane %v1038_v37, 7  ;;  %v1202_v43 = vrot.slane %v1108_v38, 6  ;;  %v1203_v44 = vrot.slane %v1108_v38, 7  ;;  %v2955_v45 = vpop.f32.mrb[9].mxu1  ;;  %v2966_v47 = vpop.f32.mrb[11].mxu0 }
 0x373   :  { %v1187_v48 = vadd.f32 %v1183_v27, %v3920_v39  ;;  %v1188_v49 = vadd.f32 %v1184_v42, %v3925_v41  ;;  %v1206_v51 = vadd.f32 %v1202_v43, %v3928_v46  ;;  %v1207_v52 = vadd.f32 %v1203_v44, %v3931_v50 }
 0x375   :  { %v2687_v53 = vmul.f32 -1.442695, %v1187_v48  ;;  %v2688_v54 = vmul.f32 -1.442695, %v1188_v49  ;;  %v2689_v55 = vmul.f32 -1.442695, %v1206_v51 }
 0x376   :  { %v2690_v56 = vmul.f32 -1.442695, %v1207_v52 }
 0x377   :  { %3352 = vpow2.f32 %v2687_v53 }
 0x378   :  { %3354 = vpow2.f32 %v2688_v54  ;;  %v1178_v57 = vpop.f32.mrb[10].mxu1 }
 0x379   :  { %3356 = vpow2.f32 %v2689_v55  ;;  %v2977_v58 = vpop.f32.mrb[11].mxu1  ;;  %v1179_v5 = vadd.f32 %v3938_v1, %v1178_v57 }
 0x37a   :  { %3358 = vpow2.f32 %v2690_v56 }
 0x37b   :  { %v1221_v6 = vrot.slane %v1179_v5, 6  ;;  %v1222_v8 = vrot.slane %v1179_v5, 7 }
 0x381   :  { %v3353_v59 = vpop.eup %3352 }
 0x382   :  { %v3355_v60 = vpop.eup %3354  ;;  %v1195_v61 = vadd.f32 1.0, %v3353_v59 }
 0x383   :  { %v3357_v62 = vpop.eup %3356  ;;  %v1196_v63 = vadd.f32 1.0, %v3355_v60 }
 0x384   :  { %v3359_v2 = vpop.eup %3358  ;;  %3360 = vrcp.f32 %v1195_v61  ;;  %v1214_v3 = vadd.f32 1.0, %v3357_v62 }
 0x385   :  { %3362 = vrcp.f32 %v1196_v63  ;;  %v1215_v4 = vadd.f32 1.0, %v3359_v2 }
 0x386   :  { %3364 = vrcp.f32 %v1214_v3 }
 0x387   :  { %3366 = vrcp.f32 %v1215_v4 }
 0x38e   :  { %v3361_v7 = vpop.eup %3360 }
 0x38f   :  { %v3363_v9 = vpop.eup %3362  ;;  %v1225_v12 = vmul.f32 %v3361_v7, %v1221_v6 }
 0x390   :  { %v3365_v15 = vpop.eup %3364  ;;  %v1226_v18 = vmul.f32 %v3363_v9, %v1222_v8 }
 0x391   :  { %v3367_v19 = vpop.eup %3366  ;;  %v1227_v22 = vadd.f32 %v1225_v12, %v3944_v10  ;;  %v1239_v23 = vmul.f32 %v3365_v15, %v1235_v11  ;;  %v1231_v29 = vsub.f32 1.0, %v3365_v15 }
 0x392   :  { %v1228_v24 = vadd.f32 %v1226_v18, %v3946_v13  ;;  %v1240_v25 = vmul.f32 %v3367_v19, %v1236_v16  ;;  %v1232_v32 = vsub.f32 1.0, %v3367_v19 }
 0x393   :  { %3368 = vtanh.f32 %v1227_v22 }
 0x394   :  { %3370 = vtanh.f32 %v1228_v24 }
 0x39d   :  { %v3369_v30 = vpop.eup %3368 }
 0x39e   :  { %v3371_v33 = vpop.eup %3370  ;;  %v1233_v36 = vmul.f32 %v3369_v30, %v1231_v29 }
 0x39f   :  { %v1234_v35 = vmul.f32 %v3371_v33, %v1232_v32 }
 0x3a0   :  { %v4029_v40 = vadd.f32 %v1239_v23, %v1233_v36 }
 0x3a1   :  { %v4031_v37 = vadd.f32 %v1240_v25, %v1234_v35 }
 0x3a2   :  { %v1245_v34 = vrot.slane %v4029_v40, 2  ;;  %v1513_v16 = vrot.slane %v4029_v40, 7 }
 0x3a3   :  { %v1246_v38 = vrot.slane %v4031_v37, 1  ;;  %v1514_v22 = vrot.slane %v4031_v37, 7 }
 0x3a5   :  { %v1247_v27 = vsel %vm695_vm4, %v1246_v38, %v1245_v34 }
 0x3a6   :  { %2987 = vmatmul.mubr.msk.f32.vlgmr.msra.gmra.mrb[12].mxu0 %vm421_vm3, %v1247_v27  ;;  %2998 = vmatmul.mubr.msk.f32.vlgmr.msra.gmra.mrb[12].mxu1 %vm421_vm3, %v1247_v27 }
 0x3a7   :  { %3223 = vmatpush3.bf16.msra.mxu0 %v3886_v28  ;;  %3008 = vmatprep.mubr.msk.f32.mxu0 %vm3670_vm2, %v3668_v0 }
 0x3a8   :  { %3224 = vmatprep.subr.bf16.mxu0 %v3669_v17  ;;  %3229 = vmatpush3.bf16.msra.mxu1 %v3861_v14 }
 0x3a9   :  { %3230 = vmatprep.subr.bf16.mxu1 %v3669_v17  ;;  %3019 = vmatprep.mubr.msk.f32.mxu1 %vm3670_vm2, %v3668_v0 }
 0x3ab   :  { %3226 = vmatpush3.bf16.msra.mxu0 %v3893_v31 }
 0x3ac   :  { %3233 = vmatprep.subr.bf16.mxu0 %v3669_v17  ;;  %3232 = vmatpush3.bf16.msra.mxu1 %v3870_v21 }
 0x3ad   :  { %3239 = vmatprep.subr.bf16.mxu1 %v3669_v17 }
 0x3ae   :  { %3009 = vmatmul.mubr.msk.f32.vlgmr.msra.gmra.mrb[14].mxu0 %vm421_vm3, %v1247_v27 }
 0x3af   :  { %3235 = vmatpush3.bf16.msra.mxu0 %v3866_v20  ;;  %3030 = vmatprep.mubr.msk.f32.mxu0 %vm3670_vm2, %v3668_v0 }
 0x3b0   :  { %3236 = vmatprep.subr.bf16.mxu0 %v3669_v17 }
 0x3b3   :  { %3238 = vmatpush3.bf16.msra.mxu0 %v3878_v26 }
 0x3b4   :  { %3245 = vmatprep.subr.bf16.mxu0 %v3669_v17 }
 0x479   :  { %v1316_v42 = vpop.f32.mrb[12].mxu0  ;;  %v1386_v43 = vpop.f32.mrb[12].mxu1 }
 0x47a   :  { %v1461_v44 = vrot.slane %v1316_v42, 5  ;;  %v1462_v45 = vrot.slane %v1316_v42, 6  ;;  %v1480_v47 = vrot.slane %v1386_v43, 5  ;;  %v1481_v48 = vrot.slane %v1386_v43, 6  ;;  %v2988_v49 = vpop.f32.mrb[13].mxu0  ;;  %v2999_v51 = vpop.f32.mrb[13].mxu1 }
 0x47c   :  { %v1465_v52 = vadd.f32 %v1461_v44, %v3920_v39  ;;  %v1466_v53 = vadd.f32 %v1462_v45, %v3925_v41  ;;  %v1484_v54 = vadd.f32 %v1480_v47, %v3928_v46  ;;  %v1485_v55 = vadd.f32 %v1481_v48, %v3931_v50 }
 0x47e   :  { %v2694_v56 = vmul.f32 -1.442695, %v1465_v52  ;;  %v2695_v57 = vmul.f32 -1.442695, %v1466_v53  ;;  %v2696_v58 = vmul.f32 -1.442695, %v1484_v54 }
 0x47f   :  { %v2697_v59 = vmul.f32 -1.442695, %v1485_v55 }
 0x480   :  { %3372 = vpow2.f32 %v2694_v56 }
 0x481   :  { %3374 = vpow2.f32 %v2695_v57  ;;  %v1456_v60 = vpop.f32.mrb[14].mxu0 }
 0x482   :  { %3376 = vpow2.f32 %v2696_v58  ;;  %v3010_v61 = vpop.f32.mrb[15].mxu0  ;;  %v1457_v8 = vadd.f32 %v3938_v1, %v1456_v60 }
 0x483   :  { %3378 = vpow2.f32 %v2697_v59 }
 0x484   :  { %v1499_v9 = vrot.slane %v1457_v8, 5  ;;  %v1500_v12 = vrot.slane %v1457_v8, 6 }
 0x48a   :  { %v3373_v62 = vpop.eup %3372 }
 0x48b   :  { %v3375_v63 = vpop.eup %3374  ;;  %v1473_v2 = vadd.f32 1.0, %v3373_v62 }
 0x48c   :  { %v3377_v3 = vpop.eup %3376  ;;  %v1474_v4 = vadd.f32 1.0, %v3375_v63 }
 0x48d   :  { %v3379_v5 = vpop.eup %3378  ;;  %3380 = vrcp.f32 %v1473_v2  ;;  %v1492_v6 = vadd.f32 1.0, %v3377_v3 }
 0x48e   :  { %3382 = vrcp.f32 %v1474_v4  ;;  %v1493_v7 = vadd.f32 1.0, %v3379_v5 }
 0x48f   :  { %3384 = vrcp.f32 %v1492_v6 }
 0x490   :  { %3386 = vrcp.f32 %v1493_v7 }
 0x497   :  { %v3381_v11 = vpop.eup %3380 }
 0x498   :  { %v3383_v15 = vpop.eup %3382  ;;  %v1503_v18 = vmul.f32 %v3381_v11, %v1499_v9 }
 0x499   :  { %v3385_v19 = vpop.eup %3384  ;;  %v1504_v23 = vmul.f32 %v3383_v15, %v1500_v12 }
 0x49a   :  { %v3387_v24 = vpop.eup %3386  ;;  %v1505_v25 = vadd.f32 %v1503_v18, %v3944_v10  ;;  %v1517_v29 = vmul.f32 %v3385_v19, %v1513_v16  ;;  %v1509_v33 = vsub.f32 1.0, %v3385_v19 }
 0x49b   :  { %v1506_v30 = vadd.f32 %v1504_v23, %v3946_v13  ;;  %v1518_v32 = vmul.f32 %v3387_v24, %v1514_v22  ;;  %v1510_v35 = vsub.f32 1.0, %v3387_v24 }
 0x49c   :  { %3388 = vtanh.f32 %v1505_v25 }
 0x49d   :  { %3390 = vtanh.f32 %v1506_v30 }
 0x4a6   :  { %v3389_v36 = vpop.eup %3388 }
 0x4a7   :  { %v3391_v34 = vpop.eup %3390  ;;  %v1511_v38 = vmul.f32 %v3389_v36, %v1509_v33 }
 0x4a8   :  { %v1512_v40 = vmul.f32 %v3391_v34, %v1510_v35 }
 0x4a9   :  { %v4066_v27 = vadd.f32 %v1517_v29, %v1511_v38 }
 0x4aa   :  { %v4068_v42 = vadd.f32 %v1518_v32, %v1512_v40 }
 0x4ab   :  { %v1523_v37 = vrot.slane %v4066_v27, 3  ;;  %v1791_v22 = vrot.slane %v4066_v27, 7 }
 0x4ac   :  { %v1524_v43 = vrot.slane %v4068_v42, 2  ;;  %v1792_v25 = vrot.slane %v4068_v42, 7 }
 0x4ae   :  { %v1525_v44 = vsel %vm695_vm4, %v1524_v43, %v1523_v37 }
 0x4af   :  { %3020 = vmatmul.mubr.msk.f32.vlgmr.msra.gmra.mrb[14].mxu1 %vm421_vm3, %v1525_v44  ;;  %3031 = vmatmul.mubr.msk.f32.vlgmr.msra.gmra.mrb[16].mxu0 %vm421_vm3, %v1525_v44 }
 0x4b0   :  { %3241 = vmatpush3.bf16.msra.mxu1 %v3886_v28  ;;  %3041 = vmatprep.mubr.msk.f32.mxu1 %vm3670_vm2, %v3668_v0 }
 0x4b1   :  { %3242 = vmatprep.subr.bf16.mxu1 %v3669_v17  ;;  %3247 = vmatpush3.bf16.msra.mxu0 %v3861_v14 }
 0x4b2   :  { %3248 = vmatprep.subr.bf16.mxu0 %v3669_v17  ;;  %3052 = vmatprep.mubr.msk.f32.mxu0 %vm3670_vm2, %v3668_v0 }
 0x4b4   :  { %3244 = vmatpush3.bf16.msra.mxu1 %v3893_v31 }
 0x4b5   :  { %3251 = vmatprep.subr.bf16.mxu1 %v3669_v17  ;;  %3250 = vmatpush3.bf16.msra.mxu0 %v3870_v21 }
 0x4b6   :  { %3257 = vmatprep.subr.bf16.mxu0 %v3669_v17 }
 0x4b7   :  { %3042 = vmatmul.mubr.msk.f32.vlgmr.msra.gmra.mrb[16].mxu1 %vm421_vm3, %v1525_v44 }
 0x4b8   :  { %3253 = vmatpush3.bf16.msra.mxu1 %v3866_v20  ;;  %3063 = vmatprep.mubr.msk.f32.mxu1 %vm3670_vm2, %v3668_v0 }
 0x4b9   :  { %3254 = vmatprep.subr.bf16.mxu1 %v3669_v17 }
 0x4bc   :  { %3256 = vmatpush3.bf16.msra.mxu1 %v3878_v26 }
 0x4bd   :  { %3263 = vmatprep.subr.bf16.mxu1 %v3669_v17 }
 0x582   :  { %v1594_v45 = vpop.f32.mrb[14].mxu1  ;;  %v1664_v47 = vpop.f32.mrb[16].mxu0 }
 0x583   :  { %v1739_v48 = vrot.slane %v1594_v45, 4  ;;  %v1740_v49 = vrot.slane %v1594_v45, 5  ;;  %v1758_v51 = vrot.slane %v1664_v47, 4  ;;  %v1759_v52 = vrot.slane %v1664_v47, 5  ;;  %v3021_v53 = vpop.f32.mrb[15].mxu1  ;;  %v3032_v54 = vpop.f32.mrb[17].mxu0 }
 0x585   :  { %v1743_v55 = vadd.f32 %v1739_v48, %v3920_v39  ;;  %v1744_v56 = vadd.f32 %v1740_v49, %v3925_v41  ;;  %v1762_v57 = vadd.f32 %v1758_v51, %v3928_v46  ;;  %v1763_v58 = vadd.f32 %v1759_v52, %v3931_v50 }
 0x587   :  { %v2701_v59 = vmul.f32 -1.442695, %v1743_v55  ;;  %v2702_v60 = vmul.f32 -1.442695, %v1744_v56  ;;  %v2703_v61 = vmul.f32 -1.442695, %v1762_v57 }
 0x588   :  { %v2704_v62 = vmul.f32 -1.442695, %v1763_v58 }
 0x589   :  { %3392 = vpow2.f32 %v2701_v59 }
 0x58a   :  { %3394 = vpow2.f32 %v2702_v60  ;;  %v1734_v63 = vpop.f32.mrb[16].mxu1 }
 0x58b   :  { %3396 = vpow2.f32 %v2703_v61  ;;  %v3043_v2 = vpop.f32.mrb[17].mxu1  ;;  %v1735_v12 = vadd.f32 %v3938_v1, %v1734_v63 }
 0x58c   :  { %3398 = vpow2.f32 %v2704_v62 }
 0x58d   :  { %v1777_v15 = vrot.slane %v1735_v12, 4  ;;  %v1778_v18 = vrot.slane %v1735_v12, 5 }
 0x593   :  { %v3393_v3 = vpop.eup %3392 }
 0x594   :  { %v3395_v4 = vpop.eup %3394  ;;  %v1751_v5 = vadd.f32 1.0, %v3393_v3 }
 0x595   :  { %v3397_v6 = vpop.eup %3396  ;;  %v1752_v7 = vadd.f32 1.0, %v3395_v4 }
 0x596   :  { %v3399_v8 = vpop.eup %3398  ;;  %3400 = vrcp.f32 %v1751_v5  ;;  %v1770_v9 = vadd.f32 1.0, %v3397_v6 }
 0x597   :  { %3402 = vrcp.f32 %v1752_v7  ;;  %v1771_v11 = vadd.f32 1.0, %v3399_v8 }
 0x598   :  { %3404 = vrcp.f32 %v1770_v9 }
 0x599   :  { %3406 = vrcp.f32 %v1771_v11 }
 0x5a0   :  { %v3401_v16 = vpop.eup %3400 }
 0x5a1   :  { %v3403_v19 = vpop.eup %3402  ;;  %v1781_v23 = vmul.f32 %v3401_v16, %v1777_v15 }
 0x5a2   :  { %v3405_v24 = vpop.eup %3404  ;;  %v1782_v29 = vmul.f32 %v3403_v19, %v1778_v18 }
 0x5a3   :  { %v3407_v30 = vpop.eup %3406  ;;  %v1783_v32 = vadd.f32 %v1781_v23, %v3944_v10  ;;  %v1795_v33 = vmul.f32 %v3405_v24, %v1791_v22  ;;  %v1787_v34 = vsub.f32 1.0, %v3405_v24 }
 0x5a4   :  { %v1784_v36 = vadd.f32 %v1782_v29, %v3946_v13  ;;  %v1796_v35 = vmul.f32 %v3407_v30, %v1792_v25  ;;  %v1788_v40 = vsub.f32 1.0, %v3407_v30 }
 0x5a5   :  { %3408 = vtanh.f32 %v1783_v32 }
 0x5a6   :  { %3410 = vtanh.f32 %v1784_v36 }
 0x5af   :  { %v3409_v38 = vpop.eup %3408 }
 0x5b0   :  { %v3411_v37 = vpop.eup %3410  ;;  %v1789_v43 = vmul.f32 %v3409_v38, %v1787_v34 }
 0x5b1   :  { %v1790_v27 = vmul.f32 %v3411_v37, %v1788_v40 }
 0x5b2   :  { %v4103_v44 = vadd.f32 %v1795_v33, %v1789_v43 }
 0x5b3   :  { %v4105_v45 = vadd.f32 %v1796_v35, %v1790_v27 }
 0x5b4   :  { %v1801_v42 = vrot.slane %v4103_v44, 4  ;;  %v2069_v25 = vrot.slane %v4103_v44, 7 }
 0x5b5   :  { %v1802_v47 = vrot.slane %v4105_v45, 3  ;;  %v2070_v32 = vrot.slane %v4105_v45, 7 }
 0x5b7   :  { %v1803_v48 = vsel %vm695_vm4, %v1802_v47, %v1801_v42 }
 0x5b8   :  { %3053 = vmatmul.mubr.msk.f32.vlgmr.msra.gmra.mrb[18].mxu0 %vm421_vm3, %v1803_v48  ;;  %3064 = vmatmul.mubr.msk.f32.vlgmr.msra.gmra.mrb[18].mxu1 %vm421_vm3, %v1803_v48 }
 0x5b9   :  { %3259 = vmatpush3.bf16.msra.mxu0 %v3886_v28  ;;  %3074 = vmatprep.mubr.msk.f32.mxu0 %vm3670_vm2, %v3668_v0 }
 0x5ba   :  { %3260 = vmatprep.subr.bf16.mxu0 %v3669_v17  ;;  %3265 = vmatpush3.bf16.msra.mxu1 %v3861_v14 }
 0x5bb   :  { %3266 = vmatprep.subr.bf16.mxu1 %v3669_v17  ;;  %3085 = vmatprep.mubr.msk.f32.mxu1 %vm3670_vm2, %v3668_v0 }
 0x5bd   :  { %3262 = vmatpush3.bf16.msra.mxu0 %v3893_v31 }
 0x5be   :  { %3269 = vmatprep.subr.bf16.mxu0 %v3669_v17  ;;  %3268 = vmatpush3.bf16.msra.mxu1 %v3870_v21 }
 0x5bf   :  { %3275 = vmatprep.subr.bf16.mxu1 %v3669_v17 }
 0x5c0   :  { %3075 = vmatmul.mubr.msk.f32.vlgmr.msra.gmra.mrb[20].mxu0 %vm421_vm3, %v1803_v48 }
 0x5c1   :  { %3271 = vmatpush3.bf16.msra.mxu0 %v3866_v20  ;;  %3096 = vmatprep.mubr.msk.f32.mxu0 %vm3670_vm2, %v3668_v0 }
 0x5c2   :  { %3272 = vmatprep.subr.bf16.mxu0 %v3669_v17 }
 0x5c5   :  { %3274 = vmatpush3.bf16.msra.mxu0 %v3878_v26 }
 0x5c6   :  { %3281 = vmatprep.subr.bf16.mxu0 %v3669_v17 }
 0x68b   :  { %v1872_v49 = vpop.f32.mrb[18].mxu0  ;;  %v1942_v51 = vpop.f32.mrb[18].mxu1 }
 0x68c   :  { %v2017_v52 = vrot.slane %v1872_v49, 3  ;;  %v2018_v53 = vrot.slane %v1872_v49, 4  ;;  %v2036_v54 = vrot.slane %v1942_v51, 3  ;;  %v2037_v55 = vrot.slane %v1942_v51, 4  ;;  %v3054_v56 = vpop.f32.mrb[19].mxu0  ;;  %v3065_v57 = vpop.f32.mrb[19].mxu1 }
 0x68e   :  { %v2021_v58 = vadd.f32 %v2017_v52, %v3920_v39  ;;  %v2022_v59 = vadd.f32 %v2018_v53, %v3925_v41  ;;  %v2040_v60 = vadd.f32 %v2036_v54, %v3928_v46  ;;  %v2041_v61 = vadd.f32 %v2037_v55, %v3931_v50 }
 0x690   :  { %v2708_v62 = vmul.f32 -1.442695, %v2021_v58  ;;  %v2709_v63 = vmul.f32 -1.442695, %v2022_v59  ;;  %v2710_v2 = vmul.f32 -1.442695, %v2040_v60 }
 0x691   :  { %v2711_v3 = vmul.f32 -1.442695, %v2041_v61 }
 0x692   :  { %3412 = vpow2.f32 %v2708_v62 }
 0x693   :  { %3414 = vpow2.f32 %v2709_v63  ;;  %v2012_v4 = vpop.f32.mrb[20].mxu0 }
 0x694   :  { %3416 = vpow2.f32 %v2710_v2  ;;  %v3076_v5 = vpop.f32.mrb[21].mxu0  ;;  %v2013_v18 = vadd.f32 %v3938_v1, %v2012_v4 }
 0x695   :  { %3418 = vpow2.f32 %v2711_v3 }
 0x696   :  { %v2055_v19 = vrot.slane %v2013_v18, 3  ;;  %v2056_v23 = vrot.slane %v2013_v18, 4 }
 0x69c   :  { %v3413_v6 = vpop.eup %3412 }
 0x69d   :  { %v3415_v7 = vpop.eup %3414  ;;  %v2029_v8 = vadd.f32 1.0, %v3413_v6 }
 0x69e   :  { %v3417_v9 = vpop.eup %3416  ;;  %v2030_v11 = vadd.f32 1.0, %v3415_v7 }
 0x69f   :  { %v3419_v12 = vpop.eup %3418  ;;  %3420 = vrcp.f32 %v2029_v8  ;;  %v2048_v15 = vadd.f32 1.0, %v3417_v9 }
 0x6a0   :  { %3422 = vrcp.f32 %v2030_v11  ;;  %v2049_v16 = vadd.f32 1.0, %v3419_v12 }
 0x6a1   :  { %3424 = vrcp.f32 %v2048_v15 }
 0x6a2   :  { %3426 = vrcp.f32 %v2049_v16 }
 0x6a9   :  { %v3421_v22 = vpop.eup %3420 }
 0x6aa   :  { %v3423_v24 = vpop.eup %3422  ;;  %v2059_v29 = vmul.f32 %v3421_v22, %v2055_v19 }
 0x6ab   :  { %v3425_v30 = vpop.eup %3424  ;;  %v2060_v33 = vmul.f32 %v3423_v24, %v2056_v23 }
 0x6ac   :  { %v3427_v36 = vpop.eup %3426  ;;  %v2061_v35 = vadd.f32 %v2059_v29, %v3944_v10  ;;  %v2073_v34 = vmul.f32 %v3425_v30, %v2069_v25  ;;  %v2065_v37 = vsub.f32 1.0, %v3425_v30 }
 0x6ad   :  { %v2062_v38 = vadd.f32 %v2060_v33, %v3946_v13  ;;  %v2074_v40 = vmul.f32 %v3427_v36, %v2070_v32  ;;  %v2066_v27 = vsub.f32 1.0, %v3427_v36 }
 0x6ae   :  { %3428 = vtanh.f32 %v2061_v35 }
 0x6af   :  { %3430 = vtanh.f32 %v2062_v38 }
 0x6b8   :  { %v3429_v43 = vpop.eup %3428 }
 0x6b9   :  { %v3431_v42 = vpop.eup %3430  ;;  %v2067_v47 = vmul.f32 %v3429_v43, %v2065_v37 }
 0x6ba   :  { %v2068_v44 = vmul.f32 %v3431_v42, %v2066_v27 }
 0x6bb   :  { %v4140_v48 = vadd.f32 %v2073_v34, %v2067_v47 }
 0x6bc   :  { %v4142_v49 = vadd.f32 %v2074_v40, %v2068_v44 }
 0x6bd   :  { %v2079_v45 = vrot.slane %v4140_v48, 5  ;;  %v2347_v24 = vrot.slane %v4140_v48, 7 }
 0x6be   :  { %v2080_v51 = vrot.slane %v4142_v49, 4  ;;  %v2348_v30 = vrot.slane %v4142_v49, 7 }
 0x6c0   :  { %v2081_v52 = vsel %vm695_vm4, %v2080_v51, %v2079_v45 }
 0x6c1   :  { %3086 = vmatmul.mubr.msk.f32.vlgmr.msra.gmra.mrb[20].mxu1 %vm421_vm3, %v2081_v52  ;;  %3097 = vmatmul.mubr.msk.f32.vlgmr.msra.gmra.mrb[22].mxu0 %vm421_vm3, %v2081_v52 }
 0x6c2   :  { %3277 = vmatpush3.bf16.msra.mxu1 %v3886_v28  ;;  %3107 = vmatprep.mubr.msk.f32.mxu1 %vm3670_vm2, %v3668_v0 }
 0x6c3   :  { %3278 = vmatprep.subr.bf16.mxu1 %v3669_v17  ;;  %3283 = vmatpush3.bf16.msra.mxu0 %v3861_v14 }
 0x6c4   :  { %3284 = vmatprep.subr.bf16.mxu0 %v3669_v17  ;;  %3118 = vmatprep.mubr.msk.f32.mxu0 %vm3670_vm2, %v3668_v0 }
 0x6c6   :  { %3280 = vmatpush3.bf16.msra.mxu1 %v3893_v31 }
 0x6c7   :  { %3287 = vmatprep.subr.bf16.mxu1 %v3669_v17  ;;  %3286 = vmatpush3.bf16.msra.mxu0 %v3870_v21 }
 0x6c8   :  { %3293 = vmatprep.subr.bf16.mxu0 %v3669_v17 }
 0x6c9   :  { %3108 = vmatmul.mubr.msk.f32.vlgmr.msra.gmra.mrb[22].mxu1 %vm421_vm3, %v2081_v52 }
 0x6ca   :  { %3289 = vmatpush3.bf16.msra.mxu1 %v3866_v20  ;;  %3129 = vmatprep.mubr.msk.f32.mxu1 %vm3670_vm2, %v3668_v0 }
 0x6cb   :  { %3290 = vmatprep.subr.bf16.mxu1 %v3669_v17 }
 0x6ce   :  { %3292 = vmatpush3.bf16.msra.mxu1 %v3878_v26 }
 0x794   :  { %v2150_v14 = vpop.f32.mrb[20].mxu1  ;;  %v2220_v53 = vpop.f32.mrb[22].mxu0 }
 0x795   :  { %v2295_v54 = vrot.slane %v2150_v14, 2  ;;  %v2296_v55 = vrot.slane %v2150_v14, 3  ;;  %v2314_v56 = vrot.slane %v2220_v53, 2  ;;  %v2315_v57 = vrot.slane %v2220_v53, 3  ;;  %v3087_v21 = vpop.f32.mrb[21].mxu1  ;;  %v3098_v58 = vpop.f32.mrb[23].mxu0 }
 0x797   :  { %v2299_v59 = vadd.f32 %v2295_v54, %v3920_v39  ;;  %v2300_v60 = vadd.f32 %v2296_v55, %v3925_v41  ;;  %v2318_v20 = vadd.f32 %v2314_v56, %v3928_v46  ;;  %v2319_v61 = vadd.f32 %v2315_v57, %v3931_v50 }
 0x799   :  { %v2715_v62 = vmul.f32 -1.442695, %v2299_v59  ;;  %v2716_v63 = vmul.f32 -1.442695, %v2300_v60  ;;  %v2717_v2 = vmul.f32 -1.442695, %v2318_v20 }
 0x79a   :  { %v2718_v26 = vmul.f32 -1.442695, %v2319_v61 }
 0x79b   :  { %3432 = vpow2.f32 %v2715_v62 }
 0x79c   :  { %3434 = vpow2.f32 %v2716_v63  ;;  %v2290_v3 = vpop.f32.mrb[22].mxu1 }
 0x79d   :  { %3436 = vpow2.f32 %v2717_v2  ;;  %v3109_v4 = vpop.f32.mrb[23].mxu1  ;;  %v2291_v16 = vadd.f32 %v3938_v1, %v2290_v3  ;;  %v3472_v3 = vld [vmem:[%s4216_s10] ss:$0 sm:$0xff]  ;;  %s3671_s10 = smov [#allocation14]  }
 0x79e   :  { %3438 = vpow2.f32 %v2718_v26  ;;  %s2648_s26 = sshll.u32 %s3671_s10, 4  ;;  %s2649_s26 = int_to_ptr.vmem [resolvable:$true] %s2648_s26 }
 0x79f   :  { %v2333_v18 = vrot.slane %v2291_v16, 2  ;;  %v2334_v22 = vrot.slane %v2291_v16, 3  ;;  %s3627_s28 = scalar_lea.vmem %s2649_s26, 32  ;;  %p3632_p1 = scmp.lt.s32.totalorder %s2649_s26, %s2649_s26 }
 0x7a0   :  { %p3628_p0 = scmp.ne.s32.totalorder %s2649_s26, %s3627_s28  ;;  %p3633_p2 = scmp.lt.s32.totalorder %s3627_s28, %s3627_s28 }
 0x7a2   :  { %p3634_p3 = por %p3633_p2, %p3632_p1 }
 0x7a4   :  { %p3635_p4 = pnand %p3634_p3, %p3628_p0 }
 0x7a5   :  { %v3433_v5 = vpop.eup %3432 }
 0x7a6   :  { %v3435_v6 = vpop.eup %3434  ;;  %v2307_v7 = vadd.f32 1.0, %v3433_v5 }
 0x7a7   :  { %v3437_v8 = vpop.eup %3436  ;;  %v2308_v9 = vadd.f32 1.0, %v3435_v6 }
 0x7a8   :  { %v3439_v11 = vpop.eup %3438  ;;  %3440 = vrcp.f32 %v2307_v7  ;;  %v2326_v12 = vadd.f32 1.0, %v3437_v8 }
 0x7a9   :  { %3442 = vrcp.f32 %v2308_v9  ;;  %v2327_v15 = vadd.f32 1.0, %v3439_v11 }
 0x7aa   :  { %3444 = vrcp.f32 %v2326_v12 }
 0x7ab   :  { %3446 = vrcp.f32 %v2327_v15 }
 0x7b2   :  { %v3441_v19 = vpop.eup %3440 }
 0x7b3   :  { %v3443_v23 = vpop.eup %3442  ;;  %v2337_v25 = vmul.f32 %v3441_v19, %v2333_v18 }
 0x7b4   :  { %v3445_v29 = vpop.eup %3444  ;;  %v2338_v32 = vmul.f32 %v3443_v23, %v2334_v22 }
 0x7b5   :  { %v3447_v33 = vpop.eup %3446  ;;  %v2339_v36 = vadd.f32 %v2337_v25, %v3944_v10  ;;  %v2351_v35 = vmul.f32 %v3445_v29, %v2347_v24  ;;  %v2343_v1 = vsub.f32 1.0, %v3445_v29 }
 0x7b6   :  { %v2340_v34 = vadd.f32 %v2338_v32, %v3946_v13  ;;  %v2352_v38 = vmul.f32 %v3447_v33, %v2348_v30  ;;  %v2344_v37 = vsub.f32 1.0, %v3447_v33 }
 0x7b7   :  { %3448 = vtanh.f32 %v2339_v36 }
 0x7b8   :  { %3450 = vtanh.f32 %v2340_v34 }
 0x7c1   :  { %v3449_v40 = vpop.eup %3448 }
 0x7c2   :  { %v3451_v43 = vpop.eup %3450  ;;  %v2345_v27 = vmul.f32 %v3449_v40, %v2343_v1 }
 0x7c3   :  { %v2346_v42 = vmul.f32 %v3451_v43, %v2344_v37 }
 0x7c4   :  { %v2353_v47 = vadd.f32 %v2351_v35, %v2345_v27 }
 0x7c5   :  { %v2354_v44 = vadd.f32 %v2352_v38, %v2346_v42 }
 0x7c6   :  { %v2357_v48 = vrot.slane %v2353_v47, 6  ;;  %v2625_v9 = vrot.slane %v2353_v47, 7 }
 0x7c7   :  { %v2358_v49 = vrot.slane %v2354_v44, 5  ;;  %v2626_v15 = vrot.slane %v2354_v44, 7 }
 0x7c9   :  { %v2359_v45 = vsel %vm695_vm4, %v2358_v49, %v2357_v48 }
 0x7ca   :  { %3119 = vmatmul.mubr.msk.f32.vlgmr.msra.gmra.mrb[24].mxu0 %vm421_vm3, %v2359_v45  ;;  %3130 = vmatmul.mubr.msk.f32.vlgmr.msra.gmra.mrb[24].mxu1 %vm421_vm3, %v2359_v45 }
 0x7cb   :  { %3295 = vmatpush3.bf16.msra.mxu0 %v3886_v28  ;;  %3140 = vmatprep.mubr.msk.f32.mxu0 %vm3670_vm2, %v3668_v0 }
 0x7cc   :  { %3296 = vmatprep.subr.bf16.mxu0 %v3669_v17 }
 0x7cf   :  { %3298 = vmatpush3.bf16.msra.mxu0 %v3893_v31 }
 0x7d2   :  { %3141 = vmatmul.mubr.msk.f32.vlgmr.msra.gmra.mrb[26].mxu0 %vm421_vm3, %v2359_v45 }
 0x89d   :  { %v2428_v51 = vpop.f32.mrb[24].mxu0  ;;  %v2498_v52 = vpop.f32.mrb[24].mxu1 }
 0x89e   :  { %v2573_v14 = vrot.slane %v2428_v51, 1  ;;  %v2574_v53 = vrot.slane %v2428_v51, 2  ;;  %v2592_v54 = vrot.slane %v2498_v52, 1  ;;  %v2593_v55 = vrot.slane %v2498_v52, 2  ;;  %v3120_v56 = vpop.f32.mrb[25].mxu0  ;;  %v3131_v57 = vpop.f32.mrb[25].mxu1 }
 0x8a0   :  { %v2577_v21 = vadd.f32 %v2573_v14, %v3920_v39  ;;  %v2578_v28 = vadd.f32 %v2574_v53, %v3925_v41  ;;  %v2596_v0 = vadd.f32 %v2592_v54, %v3928_v46  ;;  %v2597_v17 = vadd.f32 %v2593_v55, %v3931_v50 }
 0x8a2   :  { %v2722_v58 = vmul.f32 -1.442695, %v2577_v21  ;;  %v2723_v31 = vmul.f32 -1.442695, %v2578_v28  ;;  %v2724_v59 = vmul.f32 -1.442695, %v2596_v0 }
 0x8a3   :  { %v2725_v60 = vmul.f32 -1.442695, %v2597_v17 }
 0x8a4   :  { %3452 = vpow2.f32 %v2722_v58 }
 0x8a5   :  { %3454 = vpow2.f32 %v2723_v31  ;;  %v2568_v20 = vpop.f32.mrb[26].mxu0 }
 0x8a6   :  { %3456 = vpow2.f32 %v2724_v59  ;;  %v3142_v61 = vpop.f32.mrb[27].mxu0  ;;  %v2569_v4 = vadd.f32 %v3472_v3, %v2568_v20 }
 0x8a7   :  { %3458 = vpow2.f32 %v2725_v60 }
 0x8a8   :  { %v2611_v5 = vrot.slane %v2569_v4, 1  ;;  %v2612_v7 = vrot.slane %v2569_v4, 2 }
 0x8ae   :  { %v3453_v62 = vpop.eup %3452 }
 0x8af   :  { %v3455_v63 = vpop.eup %3454  ;;  %v2585_v2 = vadd.f32 1.0, %v3453_v62 }
 0x8b0   :  { %v3457_v39 = vpop.eup %3456  ;;  %v2586_v26 = vadd.f32 1.0, %v3455_v63 }
 0x8b1   :  { %v3459_v41 = vpop.eup %3458  ;;  %3460 = vrcp.f32 %v2585_v2  ;;  %v2604_v46 = vadd.f32 1.0, %v3457_v39 }
 0x8b2   :  { %3462 = vrcp.f32 %v2586_v26  ;;  %v2605_v50 = vadd.f32 1.0, %v3459_v41 }
 0x8b3   :  { %3464 = vrcp.f32 %v2604_v46 }
 0x8b4   :  { %3466 = vrcp.f32 %v2605_v50 }
 0x8bb   :  { %v3461_v6 = vpop.eup %3460 }
 0x8bc   :  { %v3463_v8 = vpop.eup %3462  ;;  %v2615_v11 = vmul.f32 %v3461_v6, %v2611_v5 }
 0x8bd   :  { %v3465_v12 = vpop.eup %3464  ;;  %v2616_v16 = vmul.f32 %v3463_v8, %v2612_v7 }
 0x8be   :  { %v3467_v18 = vpop.eup %3466  ;;  %v2617_v19 = vadd.f32 %v2615_v11, %v3944_v10  ;;  %v2629_v22 = vmul.f32 %v3465_v12, %v2625_v9  ;;  %v2621_v25 = vsub.f32 1.0, %v3465_v12 }
 0x8bf   :  { %v2618_v23 = vadd.f32 %v2616_v16, %v3946_v13  ;;  %v2630_v24 = vmul.f32 %v3467_v18, %v2626_v15  ;;  %v2622_v30 = vsub.f32 1.0, %v3467_v18 }
 0x8c0   :  { %3468 = vtanh.f32 %v2617_v19 }
 0x8c1   :  { %3470 = vtanh.f32 %v2618_v23 }
 0x8ca   :  { %v3469_v29 = vpop.eup %3468 }
 0x8cb   :  { %v3471_v32 = vpop.eup %3470  ;;  %v2623_v33 = vmul.f32 %v3469_v29, %v2621_v25 }
 0x8cc   :  { %v2624_v36 = vmul.f32 %v3471_v32, %v2622_v30 }
 0x8cd   :  { %v2631_v35 = vadd.f32 %v2629_v22, %v2623_v33 }
 0x8ce   :  { %v2632_v34 = vadd.f32 %v2630_v24, %v2624_v36 }
 0x8cf   :  { %2639 = vst.msk [vmem:[#allocation14 - $0x7] sm:$0x80] %vm2638_vm5, %v2631_v35 }
 0x8d0   :  { %v2635_v10 = vrot.slane %v2632_v34, 7 }
 0x8d2   :  { %2641 = vst.msk [vmem:[#allocation14 + $0x1] sm:$0x1] %vm2640_vm6, %v2635_v10 }
 0x8d3   :  { %3638 = shalt.err (!%p3635_p4)
}
 0x8d4   :  { %s3639_s12 = scalar_lea.hbm %s4217_s11, 32 }
 0x8d5   :  { %p3640_p5 = scmp.ne.s32.totalorder %s4217_s11, %s3639_s12  ;;  %p3643_p6 = scmp.lt.u32.totalorder %s3639_s12, %s4217_s11 }
 0x8d7   :  { %p3645_p7 = pnand %p3643_p6, %p3640_p5 }
 0x8d9   :  { %3648 = shalt.err (!%p3645_p7)
}
 0x8da   :  { %2651 = dma.vmem_to_hbm [thread:$0]  %s2649_s26, 32, %s4217_s11, [#allocation4]  }
 0x8db   :  { %3657 = dma.done.wait [#allocation4], 32  }
 0x8dc   :  { %3658 = vsyncadd [#allocation4], 4294967264 }
 0x8dd   :  { %2655 = vsyncpa [#allocation3], 1 }
 0x8de   :  { %2656 = vsyncpa [#allocation6], 1 }
 0x8df   :  { %2657 = vsyncpa [#allocation9], 1 }
 0x8e0   :  { %2658 = vsyncpa [#allocation12], 1 }
 0x8e1   :  { %2659 = vsyncpa [#allocation4], 1 }

</bundles_post_ra>
